<compile_context>
chip_gen: v6e
topology: v6e:2x2x1
jax: 0.10.0
libtpu: 0.0.40
codegen_flags: <defaults>
</compile_context>

<pallas_src>
import functools
import math

import jax
import jax.numpy as jnp
from jax.experimental import pallas as pl
from jax.experimental.pallas import tpu as pltpu

_CHUNK = 8  # inner unroll / coalesced-store granularity (one f32 sublane group)


def _round_up(x, m):
    return ((x + m - 1) // m) * m


def _pad_gate_cols(w, hid, hid_p):
    """(rows, 4*hid) -> (rows, 4*hid_p): zero-pad each gate slab to hid_p lanes."""
    if hid_p == hid:
        return w
    parts = [jnp.pad(w[:, g * hid:(g + 1) * hid], ((0, 0), (0, hid_p - hid)))
             for g in range(4)]
    return jnp.concatenate(parts, axis=1)


def _lstm_kernel(xg_ref, h0_ref, c0_ref, wh_ref,
                 out_ref, ht_ref, ct_ref, h_sc, c_sc, *, tail, chunk):
    """One time block: xg_ref holds precomputed x@Wx+b rows for this block."""
    hid_p = h0_ref.shape[1]
    tb = xg_ref.shape[0]           # time steps in this block (static)
    wd = wh_ref.dtype

    # Initialize the carried state on the first grid step only.
    @pl.when(pl.program_id(0) == 0)
    def _():
        h_sc[...] = h0_ref[...]
        c_sc[...] = c0_ref[...]

    wh = wh_ref[...]               # (hid_p, 4*hid_p), resident in VMEM

    # Only the tail of the LAST block can contain padded (invalid) steps.
    if tail:
        not_last = pl.program_id(0) < pl.num_programs(0) - 1

    h = h_sc[...]                  # (1, hid_p) f32
    c = c_sc[...]                  # (1, hid_p) f32

    # Bounded unroll: chunks of `chunk` steps, one coalesced (chunk, hid_p)
    # store per chunk (lane/sublane-dense, no masked partial stores).
    for base in range(0, tb, chunk):
        xg_c = xg_ref[base:base + chunk, :]      # (chunk, 4*hid_p) f32
        rows = []
        for k in range(base, base + chunk):
            kk = k - base
            gates = xg_c[kk:kk + 1, :] + jnp.dot(
                h.astype(wd), wh, preferred_element_type=jnp.float32)
            # Fused activations: one sigmoid over [i,f,o], one tanh over g.
            sig = jax.nn.sigmoid(gates[:, :3 * hid_p])
            g = jnp.tanh(gates[:, 3 * hid_p:])
            i = sig[:, :hid_p]
            f = sig[:, hid_p:2 * hid_p]
            o = sig[:, 2 * hid_p:3 * hid_p]
            c_new = f * c + i * g
            h_new = o * jnp.tanh(c_new)
            if tail and k >= tail:
                # Padded step: valid only when this is not the last block.
                c = jnp.where(not_last, c_new, c)
                h = jnp.where(not_last, h_new, h)
            else:
                c, h = c_new, h_new
            rows.append(h)
        out_ref[base:base + chunk, :] = jnp.concatenate(rows, axis=0)

    # Carry state to the next block; ht/ct blocks are resident (constant index
    # map), so the last grid step's values are what gets written back.
    h_sc[...] = h
    c_sc[...] = c
    ht_ref[...] = h
    ct_ref[...] = c


def lstm_forward(x_seq, h0, c0, wx, wh, b, *, block_t=32,
                 weight_dtype=jnp.bfloat16):
    """x_seq: (T, inp), h0/c0: (hid,) -> (out:(T, hid), (h_T:(hid,), c_T:(hid,)))."""
    T, inp = x_seq.shape
    hid = h0.shape[0]
    hid_p = _round_up(hid, 128)          # lane-align each gate slab

    # Time-block size: multiple of the unroll chunk, no bigger than needed.
    chunk = _CHUNK
    block_t = max(chunk, (block_t // chunk) * chunk)
    block_t = min(block_t, _round_up(T, chunk))
    n_blocks = -(-T // block_t)
    T_pad = n_blocks * block_t
    tail = T - (n_blocks - 1) * block_t
    tail = 0 if tail == block_t else tail   # 0 => last block is full (no mask)

    wd = weight_dtype
    f32 = jnp.float32

    # Gate-padded weight packing (zero pad keeps padded lanes identically 0).
    wx_p = _pad_gate_cols(wx.astype(f32), hid, hid_p)                 # (inp, 4*hid_p)
    wh_p = _pad_gate_cols(
        jnp.pad(wh.astype(f32), ((0, hid_p - hid), (0, 0))), hid, hid_p)
    b_p = _pad_gate_cols(b.astype(f32).reshape(1, -1), hid, hid_p)    # (1, 4*hid_p)

    # Hoist the whole input projection off the serial recurrence: one big
    # MXU-friendly XLA matmul; the kernel only streams (block_t, 4*hid_p) tiles.
    x_pad = jnp.pad(x_seq.astype(f32), ((0, T_pad - T), (0, 0)))
    xg = jnp.dot(x_pad.astype(wd), wx_p.astype(wd),
                 preferred_element_type=f32) + b_p                    # (T_pad, 4*hid_p)

    h0_p = jnp.pad(h0.astype(f32).reshape(1, hid), ((0, 0), (0, hid_p - hid)))
    c0_p = jnp.pad(c0.astype(f32).reshape(1, hid), ((0, 0), (0, hid_p - hid)))
    wh_k = wh_p.astype(wd)

    # Explicit VMEM budget: resident Wh (double-buffered by default) +
    # pipelined xg/out tiles + headroom.  v5e scoped default is only ~16 MiB.
    itemsize = jnp.dtype(wd).itemsize
    wh_bytes = hid_p * 4 * hid_p * itemsize
    xg_tile = block_t * 4 * hid_p * 4
    out_tile = block_t * hid_p * 4
    vmem_bytes = 2 * wh_bytes + 2 * (xg_tile + out_tile) + 24 * hid_p * 4 + (8 << 20)
    vmem_limit = int(min(max(vmem_bytes, 32 << 20), 64 << 20))

    grid_spec = pltpu.PrefetchScalarGridSpec(
        num_scalar_prefetch=0,
        grid=(n_blocks,),
        in_specs=[
            pl.BlockSpec((block_t, 4 * hid_p), lambda t: (t, 0)),   # xg tile (pipelined)
            pl.BlockSpec((1, hid_p), lambda t: (0, 0)),             # h0 (resident)
            pl.BlockSpec((1, hid_p), lambda t: (0, 0)),             # c0 (resident)
            pl.BlockSpec((hid_p, 4 * hid_p), lambda t: (0, 0)),     # Wh (resident)
        ],
        out_specs=(
            pl.BlockSpec((block_t, hid_p), lambda t: (t, 0)),       # out tile (pipelined)
            pl.BlockSpec((1, hid_p), lambda t: (0, 0)),             # h_T
            pl.BlockSpec((1, hid_p), lambda t: (0, 0)),             # c_T
        ),
        scratch_shapes=[
            pltpu.VMEM((1, hid_p), jnp.float32),                    # carried h
            pltpu.VMEM((1, hid_p), jnp.float32),                    # carried c
        ],
    )

    out, h_t, c_t = pl.pallas_call(
        functools.partial(_lstm_kernel, tail=tail, chunk=chunk),
        out_shape=(
            jax.ShapeDtypeStruct((T_pad, hid_p), jnp.float32),
            jax.ShapeDtypeStruct((1, hid_p), jnp.float32),
            jax.ShapeDtypeStruct((1, hid_p), jnp.float32),
        ),
        grid_spec=grid_spec,
        compiler_params=pltpu.CompilerParams(
            dimension_semantics=("arbitrary",),    # time axis carries state
            vmem_limit_bytes=vmem_limit),
    )(xg, h0_p, c0_p, wh_k)

    return out[:T, :hid], (h_t[0, :hid], c_t[0, :hid])


def init_lstm_params(key, inp_size, hid_size):
    """Deterministic params matching nn.Linear(inp+hid, hid) x 4 (i, f, o, g)."""
    fan_in = inp_size + hid_size
    bound = 1.0 / math.sqrt(fan_in)
    keys = jax.random.split(key, 8)
    wxs, whs, bs = [], [], []
    for gi in range(4):
        # torch weight shape: (hid, inp+hid); split input/hidden parts, transpose.
        w = jax.random.uniform(keys[2 * gi], (hid_size, fan_in),
                               minval=-bound, maxval=bound, dtype=jnp.float32)
        bb = jax.random.uniform(keys[2 * gi + 1], (hid_size,),
                                minval=-bound, maxval=bound, dtype=jnp.float32)
        wxs.append(w[:, :inp_size].T)      # (inp, hid)
        whs.append(w[:, inp_size:].T)      # (hid, hid)
        bs.append(bb)
    wx = jnp.concatenate(wxs, axis=1)      # (inp, 4*hid)
    wh = jnp.concatenate(whs, axis=1)      # (hid, 4*hid)
    b = jnp.concatenate(bs, axis=0)        # (4*hid,)
    return wx, wh, b


def lstm_reference(x_seq, h0, c0, wx, wh, b):
    """Pure-JAX f32 reference mirroring the PyTorch forward."""
    hid = h0.shape[0]
    h, c = h0, c0
    outs = []
    for t in range(x_seq.shape[0]):
        gates = x_seq[t] @ wx + h @ wh + b
        i = jax.nn.sigmoid(gates[0 * hid:1 * hid])
        f = jax.nn.sigmoid(gates[1 * hid:2 * hid])
        o = jax.nn.sigmoid(gates[2 * hid:3 * hid])
        g = jnp.tanh(gates[3 * hid:4 * hid])
        c = f * c + i * g
        h = o * jnp.tanh(c)
        outs.append(h)
    return jnp.stack(outs), (h, c)


if __name__ == "__main__":
    inp_size, hid_size, seq_len = 16, 32, 8

    key = jax.random.PRNGKey(0)
    k_x, k_h, k_c, k_p = jax.random.split(key, 4)

    x_seq = jax.random.normal(k_x, (seq_len, inp_size), dtype=jnp.float32)
    h0 = jax.random.normal(k_h, (hid_size,), dtype=jnp.float32)
    c0 = jax.random.normal(k_c, (hid_size,), dtype=jnp.float32)
    wx, wh, b = init_lstm_params(k_p, inp_size, hid_size)

    out_ref, (h_ref, c_ref) = lstm_reference(x_seq, h0, c0, wx, wh, b)

    # 1) f32 weights: tight check against the pure-JAX reference.
    out, (h_t, c_t) = lstm_forward(x_seq, h0, c0, wx, wh, b,
                                   weight_dtype=jnp.float32)
    jax.block_until_ready((out, h_t, c_t))
    assert jnp.allclose(out, out_ref, atol=1e-5, rtol=1e-5)
    assert jnp.allclose(h_t, h_ref, atol=1e-5, rtol=1e-5)
    assert jnp.allclose(c_t, c_ref, atol=1e-5, rtol=1e-5)

    # 2) bf16 weights (default, MXU-native): looser tolerance (f32 accum/state).
    out_bf, (h_bf, c_bf) = lstm_forward(x_seq, h0, c0, wx, wh, b)
    jax.block_until_ready((out_bf, h_bf, c_bf))
    assert jnp.allclose(out_bf, out_ref, atol=3e-2)
    assert jnp.allclose(h_bf, h_ref, atol=3e-2)
    assert jnp.allclose(c_bf, c_ref, atol=3e-2)

    # 3) Non-divisible sequence length exercises the padded / masked tail path.
    T2 = 13
    x2 = jax.random.normal(jax.random.PRNGKey(1), (T2, inp_size), dtype=jnp.float32)
    out2, (h2, c2) = lstm_forward(x2, h0, c0, wx, wh, b,
                                  block_t=8, weight_dtype=jnp.float32)
    jax.block_until_ready((out2, h2, c2))
    out2_ref, (h2_ref, c2_ref) = lstm_reference(x2, h0, c0, wx, wh, b)
    assert jnp.allclose(out2, out2_ref, atol=1e-5, rtol=1e-5)
    assert jnp.allclose(h2, h2_ref, atol=1e-5, rtol=1e-5)
    assert jnp.allclose(c2, c2_ref, atol=1e-5, rtol=1e-5)

    print("KERNEL_OK")
</pallas_src>

<mosaic_0001>
module attributes {stable_mosaic.version = 11 : i64} {
  func.func @_lstm_kernel(%arg0: i32, %arg1: memref<8x512xf32, #tpu.memory_space<vmem>>, %arg2: memref<1x128xf32, #tpu.memory_space<vmem>>, %arg3: memref<1x128xf32, #tpu.memory_space<vmem>>, %arg4: memref<128x512xf32, #tpu.memory_space<vmem>>, %arg5: memref<8x128xf32, #tpu.memory_space<vmem>>, %arg6: memref<1x128xf32, #tpu.memory_space<vmem>>, %arg7: memref<1x128xf32, #tpu.memory_space<vmem>>, %arg8: memref<1x128xf32, #tpu.memory_space<vmem>>, %arg9: memref<1x128xf32, #tpu.memory_space<vmem>>) attributes {dimension_semantics = [#tpu.dimension_semantics<arbitrary>], iteration_bounds = array<i64: 1>, scalar_prefetch = 0 : i64, scratch_operands = 2 : i64, tpu.core_type = #tpu.core_type<tc>, window_params = [{transform_indices = @transform_0, window_bounds = array<i64: 8, 512>}, {pipeline_mode = #tpu.pipeline_mode<synchronous>, transform_indices = @transform_1, window_bounds = array<i64: 1, 128>}, {pipeline_mode = #tpu.pipeline_mode<synchronous>, transform_indices = @transform_2, window_bounds = array<i64: 1, 128>}, {pipeline_mode = #tpu.pipeline_mode<synchronous>, transform_indices = @transform_3, window_bounds = array<i64: 128, 512>}, {transform_indices = @transform_4, window_bounds = array<i64: 8, 128>}, {pipeline_mode = #tpu.pipeline_mode<synchronous>, transform_indices = @transform_5, window_bounds = array<i64: 1, 128>}, {pipeline_mode = #tpu.pipeline_mode<synchronous>, transform_indices = @transform_6, window_bounds = array<i64: 1, 128>}]} {
    %c0_i32 = arith.constant 0 : i32
    %0 = arith.cmpi eq, %arg0, %c0_i32 : i32
    %1 = arith.extui %0 : i1 to i32
    %c0_i32_0 = arith.constant 0 : i32
    %2 = arith.cmpi ne, %1, %c0_i32_0 : i32
    scf.if %2 {
      %c0_33 = arith.constant 0 : index
      %c0_34 = arith.constant 0 : index
      %165 = vector.load %arg2[%c0_33, %c0_34] : memref<1x128xf32, #tpu.memory_space<vmem>>, vector<1x128xf32>
      %c0_35 = arith.constant 0 : index
      %c0_36 = arith.constant 0 : index
      %166 = vector.load %arg8[%c0_35, %c0_36] : memref<1x128xf32, #tpu.memory_space<vmem>>, vector<1x128xf32>
      tpu.vector_store %arg8[%c0_35, %c0_36], %165 {strides = array<i32>} : memref<1x128xf32, #tpu.memory_space<vmem>>, vector<1x128xf32>,
      %c0_37 = arith.constant 0 : index
      %c0_38 = arith.constant 0 : index
      %167 = vector.load %arg3[%c0_37, %c0_38] : memref<1x128xf32, #tpu.memory_space<vmem>>, vector<1x128xf32>
      %c0_39 = arith.constant 0 : index
      %c0_40 = arith.constant 0 : index
      %168 = vector.load %arg9[%c0_39, %c0_40] : memref<1x128xf32, #tpu.memory_space<vmem>>, vector<1x128xf32>
      tpu.vector_store %arg9[%c0_39, %c0_40], %167 {strides = array<i32>} : memref<1x128xf32, #tpu.memory_space<vmem>>, vector<1x128xf32>,
    } else {
    }
    %c0 = arith.constant 0 : index
    %c0_1 = arith.constant 0 : index
    %3 = vector.load %arg4[%c0, %c0_1] : memref<128x512xf32, #tpu.memory_space<vmem>>, vector<128x512xf32>
    %c0_2 = arith.constant 0 : index
    %c0_3 = arith.constant 0 : index
    %4 = vector.load %arg8[%c0_2, %c0_3] : memref<1x128xf32, #tpu.memory_space<vmem>>, vector<1x128xf32>
    %c0_4 = arith.constant 0 : index
    %c0_5 = arith.constant 0 : index
    %5 = vector.load %arg9[%c0_4, %c0_5] : memref<1x128xf32, #tpu.memory_space<vmem>>, vector<1x128xf32>
    %c0_6 = arith.constant 0 : index
    %c0_7 = arith.constant 0 : index
    %6 = vector.load %arg1[%c0_6, %c0_7] : memref<8x512xf32, #tpu.memory_space<vmem>>, vector<8x512xf32>
    %7 = vector.extract_strided_slice %6 {offsets = [0, 0], sizes = [1, 512], strides = [1, 1]} : vector<8x512xf32> to vector<1x512xf32>
    %cst = arith.constant dense<0.000000e+00> : vector<1x512xf32>
    %8 = tpu.matmul %4, %3, %cst {dimension_numbers = #tpu.dot_dimension_numbers<[1], [0], [0], [1], [0, 0, 1, 1], [], []>} : vector<1x128xf32>, vector<128x512xf32>, vector<1x512xf32> -> vector<1x512xf32>
    %9 = arith.addf %7, %8 : vector<1x512xf32>
    %10 = vector.extract_strided_slice %9 {offsets = [0, 0], sizes = [1, 384], strides = [1, 1]} : vector<1x512xf32> to vector<1x384xf32>
    %11 = arith.negf %10 : vector<1x384xf32>
    %12 = math.exp %11 : vector<1x384xf32>
    %cst_8 = arith.constant 1.000000e+00 : f32
    %13 = vector.broadcast %cst_8 : f32 to vector<1x384xf32>
    %14 = arith.addf %13, %12 : vector<1x384xf32>
    %15 = arith.divf %13, %14 : vector<1x384xf32>
    %16 = vector.extract_strided_slice %9 {offsets = [0, 384], sizes = [1, 128], strides = [1, 1]} : vector<1x512xf32> to vector<1x128xf32>
    %17 = math.tanh %16 : vector<1x128xf32>
    %18 = vector.extract_strided_slice %15 {offsets = [0, 0], sizes = [1, 128], strides = [1, 1]} : vector<1x384xf32> to vector<1x128xf32>
    %19 = vector.extract_strided_slice %15 {offsets = [0, 128], sizes = [1, 128], strides = [1, 1]} : vector<1x384xf32> to vector<1x128xf32>
    %20 = vector.extract_strided_slice %15 {offsets = [0, 256], sizes = [1, 128], strides = [1, 1]} : vector<1x384xf32> to vector<1x128xf32>
    %21 = arith.mulf %19, %5 : vector<1x128xf32>
    %22 = arith.mulf %18, %17 : vector<1x128xf32>
    %23 = arith.addf %21, %22 : vector<1x128xf32>
    %24 = math.tanh %23 : vector<1x128xf32>
    %25 = arith.mulf %20, %24 : vector<1x128xf32>
    %26 = vector.extract_strided_slice %6 {offsets = [1, 0], sizes = [1, 512], strides = [1, 1]} : vector<8x512xf32> to vector<1x512xf32>
    %cst_9 = arith.constant dense<0.000000e+00> : vector<1x512xf32>
    %27 = tpu.matmul %25, %3, %cst_9 {dimension_numbers = #tpu.dot_dimension_numbers<[1], [0], [0], [1], [0, 0, 1, 1], [], []>} : vector<1x128xf32>, vector<128x512xf32>, vector<1x512xf32> -> vector<1x512xf32>
    %28 = arith.addf %26, %27 : vector<1x512xf32>
    %29 = vector.extract_strided_slice %28 {offsets = [0, 0], sizes = [1, 384], strides = [1, 1]} : vector<1x512xf32> to vector<1x384xf32>
    %30 = arith.negf %29 : vector<1x384xf32>
    %31 = math.exp %30 : vector<1x384xf32>
    %cst_10 = arith.constant 1.000000e+00 : f32
    %32 = vector.broadcast %cst_10 : f32 to vector<1x384xf32>
    %33 = arith.addf %32, %31 : vector<1x384xf32>
    %34 = arith.divf %32, %33 : vector<1x384xf32>
    %35 = vector.extract_strided_slice %28 {offsets = [0, 384], sizes = [1, 128], strides = [1, 1]} : vector<1x512xf32> to vector<1x128xf32>
    %36 = math.tanh %35 : vector<1x128xf32>
    %37 = vector.extract_strided_slice %34 {offsets = [0, 0], sizes = [1, 128], strides = [1, 1]} : vector<1x384xf32> to vector<1x128xf32>
    %38 = vector.extract_strided_slice %34 {offsets = [0, 128], sizes = [1, 128], strides = [1, 1]} : vector<1x384xf32> to vector<1x128xf32>
    %39 = vector.extract_strided_slice %34 {offsets = [0, 256], sizes = [1, 128], strides = [1, 1]} : vector<1x384xf32> to vector<1x128xf32>
    %40 = arith.mulf %38, %23 : vector<1x128xf32>
    %41 = arith.mulf %37, %36 : vector<1x128xf32>
    %42 = arith.addf %40, %41 : vector<1x128xf32>
    %43 = math.tanh %42 : vector<1x128xf32>
    %44 = arith.mulf %39, %43 : vector<1x128xf32>
    %45 = vector.extract_strided_slice %6 {offsets = [2, 0], sizes = [1, 512], strides = [1, 1]} : vector<8x512xf32> to vector<1x512xf32>
    %cst_11 = arith.constant dense<0.000000e+00> : vector<1x512xf32>
    %46 = tpu.matmul %44, %3, %cst_11 {dimension_numbers = #tpu.dot_dimension_numbers<[1], [0], [0], [1], [0, 0, 1, 1], [], []>} : vector<1x128xf32>, vector<128x512xf32>, vector<1x512xf32> -> vector<1x512xf32>
    %47 = arith.addf %45, %46 : vector<1x512xf32>
    %48 = vector.extract_strided_slice %47 {offsets = [0, 0], sizes = [1, 384], strides = [1, 1]} : vector<1x512xf32> to vector<1x384xf32>
    %49 = arith.negf %48 : vector<1x384xf32>
    %50 = math.exp %49 : vector<1x384xf32>
    %cst_12 = arith.constant 1.000000e+00 : f32
    %51 = vector.broadcast %cst_12 : f32 to vector<1x384xf32>
    %52 = arith.addf %51, %50 : vector<1x384xf32>
    %53 = arith.divf %51, %52 : vector<1x384xf32>
    %54 = vector.extract_strided_slice %47 {offsets = [0, 384], sizes = [1, 128], strides = [1, 1]} : vector<1x512xf32> to vector<1x128xf32>
    %55 = math.tanh %54 : vector<1x128xf32>
    %56 = vector.extract_strided_slice %53 {offsets = [0, 0], sizes = [1, 128], strides = [1, 1]} : vector<1x384xf32> to vector<1x128xf32>
    %57 = vector.extract_strided_slice %53 {offsets = [0, 128], sizes = [1, 128], strides = [1, 1]} : vector<1x384xf32> to vector<1x128xf32>
    %58 = vector.extract_strided_slice %53 {offsets = [0, 256], sizes = [1, 128], strides = [1, 1]} : vector<1x384xf32> to vector<1x128xf32>
    %59 = arith.mulf %57, %42 : vector<1x128xf32>
    %60 = arith.mulf %56, %55 : vector<1x128xf32>
    %61 = arith.addf %59, %60 : vector<1x128xf32>
    %62 = math.tanh %61 : vector<1x128xf32>
    %63 = arith.mulf %58, %62 : vector<1x128xf32>
    %64 = vector.extract_strided_slice %6 {offsets = [3, 0], sizes = [1, 512], strides = [1, 1]} : vector<8x512xf32> to vector<1x512xf32>
    %cst_13 = arith.constant dense<0.000000e+00> : vector<1x512xf32>
    %65 = tpu.matmul %63, %3, %cst_13 {dimension_numbers = #tpu.dot_dimension_numbers<[1], [0], [0], [1], [0, 0, 1, 1], [], []>} : vector<1x128xf32>, vector<128x512xf32>, vector<1x512xf32> -> vector<1x512xf32>
    %66 = arith.addf %64, %65 : vector<1x512xf32>
    %67 = vector.extract_strided_slice %66 {offsets = [0, 0], sizes = [1, 384], strides = [1, 1]} : vector<1x512xf32> to vector<1x384xf32>
    %68 = arith.negf %67 : vector<1x384xf32>
    %69 = math.exp %68 : vector<1x384xf32>
    %cst_14 = arith.constant 1.000000e+00 : f32
    %70 = vector.broadcast %cst_14 : f32 to vector<1x384xf32>
    %71 = arith.addf %70, %69 : vector<1x384xf32>
    %72 = arith.divf %70, %71 : vector<1x384xf32>
    %73 = vector.extract_strided_slice %66 {offsets = [0, 384], sizes = [1, 128], strides = [1, 1]} : vector<1x512xf32> to vector<1x128xf32>
    %74 = math.tanh %73 : vector<1x128xf32>
    %75 = vector.extract_strided_slice %72 {offsets = [0, 0], sizes = [1, 128], strides = [1, 1]} : vector<1x384xf32> to vector<1x128xf32>
    %76 = vector.extract_strided_slice %72 {offsets = [0, 128], sizes = [1, 128], strides = [1, 1]} : vector<1x384xf32> to vector<1x128xf32>
    %77 = vector.extract_strided_slice %72 {offsets = [0, 256], sizes = [1, 128], strides = [1, 1]} : vector<1x384xf32> to vector<1x128xf32>
    %78 = arith.mulf %76, %61 : vector<1x128xf32>
    %79 = arith.mulf %75, %74 : vector<1x128xf32>
    %80 = arith.addf %78, %79 : vector<1x128xf32>
    %81 = math.tanh %80 : vector<1x128xf32>
    %82 = arith.mulf %77, %81 : vector<1x128xf32>
    %83 = vector.extract_strided_slice %6 {offsets = [4, 0], sizes = [1, 512], strides = [1, 1]} : vector<8x512xf32> to vector<1x512xf32>
    %cst_15 = arith.constant dense<0.000000e+00> : vector<1x512xf32>
    %84 = tpu.matmul %82, %3, %cst_15 {dimension_numbers = #tpu.dot_dimension_numbers<[1], [0], [0], [1], [0, 0, 1, 1], [], []>} : vector<1x128xf32>, vector<128x512xf32>, vector<1x512xf32> -> vector<1x512xf32>
    %85 = arith.addf %83, %84 : vector<1x512xf32>
    %86 = vector.extract_strided_slice %85 {offsets = [0, 0], sizes = [1, 384], strides = [1, 1]} : vector<1x512xf32> to vector<1x384xf32>
    %87 = arith.negf %86 : vector<1x384xf32>
    %88 = math.exp %87 : vector<1x384xf32>
    %cst_16 = arith.constant 1.000000e+00 : f32
    %89 = vector.broadcast %cst_16 : f32 to vector<1x384xf32>
    %90 = arith.addf %89, %88 : vector<1x384xf32>
    %91 = arith.divf %89, %90 : vector<1x384xf32>
    %92 = vector.extract_strided_slice %85 {offsets = [0, 384], sizes = [1, 128], strides = [1, 1]} : vector<1x512xf32> to vector<1x128xf32>
    %93 = math.tanh %92 : vector<1x128xf32>
    %94 = vector.extract_strided_slice %91 {offsets = [0, 0], sizes = [1, 128], strides = [1, 1]} : vector<1x384xf32> to vector<1x128xf32>
    %95 = vector.extract_strided_slice %91 {offsets = [0, 128], sizes = [1, 128], strides = [1, 1]} : vector<1x384xf32> to vector<1x128xf32>
    %96 = vector.extract_strided_slice %91 {offsets = [0, 256], sizes = [1, 128], strides = [1, 1]} : vector<1x384xf32> to vector<1x128xf32>
    %97 = arith.mulf %95, %80 : vector<1x128xf32>
    %98 = arith.mulf %94, %93 : vector<1x128xf32>
    %99 = arith.addf %97, %98 : vector<1x128xf32>
    %100 = math.tanh %99 : vector<1x128xf32>
    %101 = arith.mulf %96, %100 : vector<1x128xf32>
    %102 = vector.extract_strided_slice %6 {offsets = [5, 0], sizes = [1, 512], strides = [1, 1]} : vector<8x512xf32> to vector<1x512xf32>
    %cst_17 = arith.constant dense<0.000000e+00> : vector<1x512xf32>
    %103 = tpu.matmul %101, %3, %cst_17 {dimension_numbers = #tpu.dot_dimension_numbers<[1], [0], [0], [1], [0, 0, 1, 1], [], []>} : vector<1x128xf32>, vector<128x512xf32>, vector<1x512xf32> -> vector<1x512xf32>
    %104 = arith.addf %102, %103 : vector<1x512xf32>
    %105 = vector.extract_strided_slice %104 {offsets = [0, 0], sizes = [1, 384], strides = [1, 1]} : vector<1x512xf32> to vector<1x384xf32>
    %106 = arith.negf %105 : vector<1x384xf32>
    %107 = math.exp %106 : vector<1x384xf32>
    %cst_18 = arith.constant 1.000000e+00 : f32
    %108 = vector.broadcast %cst_18 : f32 to vector<1x384xf32>
    %109 = arith.addf %108, %107 : vector<1x384xf32>
    %110 = arith.divf %108, %109 : vector<1x384xf32>
    %111 = vector.extract_strided_slice %104 {offsets = [0, 384], sizes = [1, 128], strides = [1, 1]} : vector<1x512xf32> to vector<1x128xf32>
    %112 = math.tanh %111 : vector<1x128xf32>
    %113 = vector.extract_strided_slice %110 {offsets = [0, 0], sizes = [1, 128], strides = [1, 1]} : vector<1x384xf32> to vector<1x128xf32>
    %114 = vector.extract_strided_slice %110 {offsets = [0, 128], sizes = [1, 128], strides = [1, 1]} : vector<1x384xf32> to vector<1x128xf32>
    %115 = vector.extract_strided_slice %110 {offsets = [0, 256], sizes = [1, 128], strides = [1, 1]} : vector<1x384xf32> to vector<1x128xf32>
    %116 = arith.mulf %114, %99 : vector<1x128xf32>
    %117 = arith.mulf %113, %112 : vector<1x128xf32>
    %118 = arith.addf %116, %117 : vector<1x128xf32>
    %119 = math.tanh %118 : vector<1x128xf32>
    %120 = arith.mulf %115, %119 : vector<1x128xf32>
    %121 = vector.extract_strided_slice %6 {offsets = [6, 0], sizes = [1, 512], strides = [1, 1]} : vector<8x512xf32> to vector<1x512xf32>
    %cst_19 = arith.constant dense<0.000000e+00> : vector<1x512xf32>
    %122 = tpu.matmul %120, %3, %cst_19 {dimension_numbers = #tpu.dot_dimension_numbers<[1], [0], [0], [1], [0, 0, 1, 1], [], []>} : vector<1x128xf32>, vector<128x512xf32>, vector<1x512xf32> -> vector<1x512xf32>
    %123 = arith.addf %121, %122 : vector<1x512xf32>
    %124 = vector.extract_strided_slice %123 {offsets = [0, 0], sizes = [1, 384], strides = [1, 1]} : vector<1x512xf32> to vector<1x384xf32>
    %125 = arith.negf %124 : vector<1x384xf32>
    %126 = math.exp %125 : vector<1x384xf32>
    %cst_20 = arith.constant 1.000000e+00 : f32
    %127 = vector.broadcast %cst_20 : f32 to vector<1x384xf32>
    %128 = arith.addf %127, %126 : vector<1x384xf32>
    %129 = arith.divf %127, %128 : vector<1x384xf32>
    %130 = vector.extract_strided_slice %123 {offsets = [0, 384], sizes = [1, 128], strides = [1, 1]} : vector<1x512xf32> to vector<1x128xf32>
    %131 = math.tanh %130 : vector<1x128xf32>
    %132 = vector.extract_strided_slice %129 {offsets = [0, 0], sizes = [1, 128], strides = [1, 1]} : vector<1x384xf32> to vector<1x128xf32>
    %133 = vector.extract_strided_slice %129 {offsets = [0, 128], sizes = [1, 128], strides = [1, 1]} : vector<1x384xf32> to vector<1x128xf32>
    %134 = vector.extract_strided_slice %129 {offsets = [0, 256], sizes = [1, 128], strides = [1, 1]} : vector<1x384xf32> to vector<1x128xf32>
    %135 = arith.mulf %133, %118 : vector<1x128xf32>
    %136 = arith.mulf %132, %131 : vector<1x128xf32>
    %137 = arith.addf %135, %136 : vector<1x128xf32>
    %138 = math.tanh %137 : vector<1x128xf32>
    %139 = arith.mulf %134, %138 : vector<1x128xf32>
    %140 = vector.extract_strided_slice %6 {offsets = [7, 0], sizes = [1, 512], strides = [1, 1]} : vector<8x512xf32> to vector<1x512xf32>
    %cst_21 = arith.constant dense<0.000000e+00> : vector<1x512xf32>
    %141 = tpu.matmul %139, %3, %cst_21 {dimension_numbers = #tpu.dot_dimension_numbers<[1], [0], [0], [1], [0, 0, 1, 1], [], []>} : vector<1x128xf32>, vector<128x512xf32>, vector<1x512xf32> -> vector<1x512xf32>
    %142 = arith.addf %140, %141 : vector<1x512xf32>
    %143 = vector.extract_strided_slice %142 {offsets = [0, 0], sizes = [1, 384], strides = [1, 1]} : vector<1x512xf32> to vector<1x384xf32>
    %144 = arith.negf %143 : vector<1x384xf32>
    %145 = math.exp %144 : vector<1x384xf32>
    %cst_22 = arith.constant 1.000000e+00 : f32
    %146 = vector.broadcast %cst_22 : f32 to vector<1x384xf32>
    %147 = arith.addf %146, %145 : vector<1x384xf32>
    %148 = arith.divf %146, %147 : vector<1x384xf32>
    %149 = vector.extract_strided_slice %142 {offsets = [0, 384], sizes = [1, 128], strides = [1, 1]} : vector<1x512xf32> to vector<1x128xf32>
    %150 = math.tanh %149 : vector<1x128xf32>
    %151 = vector.extract_strided_slice %148 {offsets = [0, 0], sizes = [1, 128], strides = [1, 1]} : vector<1x384xf32> to vector<1x128xf32>
    %152 = vector.extract_strided_slice %148 {offsets = [0, 128], sizes = [1, 128], strides = [1, 1]} : vector<1x384xf32> to vector<1x128xf32>
    %153 = vector.extract_strided_slice %148 {offsets = [0, 256], sizes = [1, 128], strides = [1, 1]} : vector<1x384xf32> to vector<1x128xf32>
    %154 = arith.mulf %152, %137 : vector<1x128xf32>
    %155 = arith.mulf %151, %150 : vector<1x128xf32>
    %156 = arith.addf %154, %155 : vector<1x128xf32>
    %157 = math.tanh %156 : vector<1x128xf32>
    %158 = arith.mulf %153, %157 : vector<1x128xf32>
    %159 = tpu.concatenate %25, %44, %63, %82, %101, %120, %139, %158 in 0 : vector<1x128xf32>, vector<1x128xf32>, vector<1x128xf32>, vector<1x128xf32>, vector<1x128xf32>, vector<1x128xf32>, vector<1x128xf32>, vector<1x128xf32> -> vector<8x128xf32>
    %c0_23 = arith.constant 0 : index
    %c0_24 = arith.constant 0 : index
    %160 = vector.load %arg5[%c0_23, %c0_24] : memref<8x128xf32, #tpu.memory_space<vmem>>, vector<8x128xf32>
    tpu.vector_store %arg5[%c0_23, %c0_24], %159 {strides = array<i32>} : memref<8x128xf32, #tpu.memory_space<vmem>>, vector<8x128xf32>,
    %c0_25 = arith.constant 0 : index
    %c0_26 = arith.constant 0 : index
    %161 = vector.load %arg8[%c0_25, %c0_26] : memref<1x128xf32, #tpu.memory_space<vmem>>, vector<1x128xf32>
    tpu.vector_store %arg8[%c0_25, %c0_26], %158 {strides = array<i32>} : memref<1x128xf32, #tpu.memory_space<vmem>>, vector<1x128xf32>,
    %c0_27 = arith.constant 0 : index
    %c0_28 = arith.constant 0 : index
    %162 = vector.load %arg9[%c0_27, %c0_28] : memref<1x128xf32, #tpu.memory_space<vmem>>, vector<1x128xf32>
    tpu.vector_store %arg9[%c0_27, %c0_28], %156 {strides = array<i32>} : memref<1x128xf32, #tpu.memory_space<vmem>>, vector<1x128xf32>,
    %c0_29 = arith.constant 0 : index
    %c0_30 = arith.constant 0 : index
    %163 = vector.load %arg6[%c0_29, %c0_30] : memref<1x128xf32, #tpu.memory_space<vmem>>, vector<1x128xf32>
    tpu.vector_store %arg6[%c0_29, %c0_30], %158 {strides = array<i32>} : memref<1x128xf32, #tpu.memory_space<vmem>>, vector<1x128xf32>,
    %c0_31 = arith.constant 0 : index
    %c0_32 = arith.constant 0 : index
    %164 = vector.load %arg7[%c0_31, %c0_32] : memref<1x128xf32, #tpu.memory_space<vmem>>, vector<1x128xf32>
    tpu.vector_store %arg7[%c0_31, %c0_32], %156 {strides = array<i32>} : memref<1x128xf32, #tpu.memory_space<vmem>>, vector<1x128xf32>,
    return
  }
  func.func @transform_0(%arg0: i32) -> (i32, i32) {
    %c0_i32 = arith.constant 0 : i32
    %c0_i32_0 = arith.constant 0 : i32
    return %arg0, %c0_i32 : i32, i32
  }
  func.func @transform_1(%arg0: i32) -> (i32, i32) {
    %c0_i32 = arith.constant 0 : i32
    %c0_i32_0 = arith.constant 0 : i32
    %c0_i32_1 = arith.constant 0 : i32
    return %c0_i32, %c0_i32_0 : i32, i32
  }
  func.func @transform_2(%arg0: i32) -> (i32, i32) {
    %c0_i32 = arith.constant 0 : i32
    %c0_i32_0 = arith.constant 0 : i32
    %c0_i32_1 = arith.constant 0 : i32
    return %c0_i32, %c0_i32_0 : i32, i32
  }
  func.func @transform_3(%arg0: i32) -> (i32, i32) {
    %c0_i32 = arith.constant 0 : i32
    %c0_i32_0 = arith.constant 0 : i32
    %c0_i32_1 = arith.constant 0 : i32
    return %c0_i32, %c0_i32_0 : i32, i32
  }
  func.func @transform_4(%arg0: i32) -> (i32, i32) {
    %c0_i32 = arith.constant 0 : i32
    %c0_i32_0 = arith.constant 0 : i32
    return %arg0, %c0_i32 : i32, i32
  }
  func.func @transform_5(%arg0: i32) -> (i32, i32) {
    %c0_i32 = arith.constant 0 : i32
    %c0_i32_0 = arith.constant 0 : i32
    %c0_i32_1 = arith.constant 0 : i32
    return %c0_i32, %c0_i32_0 : i32, i32
  }
  func.func @transform_6(%arg0: i32) -> (i32, i32) {
    %c0_i32 = arith.constant 0 : i32
    %c0_i32_0 = arith.constant 0 : i32
    %c0_i32_1 = arith.constant 0 : i32
    return %c0_i32, %c0_i32_0 : i32, i32
  }
}

</mosaic_0001>

<bundles_post_ra>
// kernel: tpu_custom_call.1
= control target key start
LH: loop header
LB: loop body
LE: loop exit
PB: predicated region body
PF: predicated region fallthrough
CT: control target
= control target key end

     0   :  { %12 = vsyncpa [#allocation5], 0  ;;  %s2948_s0 = inlined_call_operand.hbm [shape: f32[8,512], index: 0, kind: input, shape index: {}]   ;;  %s2949_s1 = inlined_call_operand.vmem [shape: f32[1,128], index: 1, kind: input, shape index: {}]   ;;  %s2950_s2 = inlined_call_operand.vmem [shape: f32[1,128], index: 2, kind: input, shape index: {}]   ;;  %s2951_s3 = inlined_call_operand.hbm [shape: f32[128,512], index: 3, kind: input, shape index: {}]   ;;  %s2952_s4 = inlined_call_operand.hbm [shape: f32[8,128], index: 4, kind: output, shape index: {0}]   ;;  %s2953_s5 = inlined_call_operand.hbm [shape: f32[1,128], index: 5, kind: output, shape index: {1}]   ;;  %s2954_s6 = inlined_call_operand.hbm [shape: f32[1,128], index: 6, kind: output, shape index: {2}]  }
   0x1   :  { %13 = vsyncpa [#allocation8], 0 }
   0x2   :  { %14 = vsyncpa [#allocation6], 0 }
   0x3   :  { %15 = vsyncpa [#allocation11], 0  ;;  %s2007_s21 = smov [#allocation4]   ;;  %s2008_s23 = smov [#allocation7]  }
   0x4   :  { %s22_s22 = sshll.u32 %s2007_s21, 4  ;;  %s35_s24 = sshll.u32 %s2008_s23, 4  ;;  %s23_s22 = int_to_ptr.vmem [resolvable:$true] %s22_s22  ;;  %s36_s24 = int_to_ptr.vmem [resolvable:$true] %s35_s24 }
   0x5   :  { %s1907_s25 = scalar_lea.vmem %s23_s22, 512  ;;  %p1912_p1 = scmp.lt.s32.totalorder %s23_s22, %s23_s22 }
   0x6   :  { %p1908_p0 = scmp.ne.s32.totalorder %s23_s22, %s1907_s25  ;;  %p1913_p2 = scmp.lt.s32.totalorder %s1907_s25, %s1907_s25 }
   0x8   :  { %p1914_p3 = por %p1913_p2, %p1912_p1 }
   0xa   :  { %p1915_p4 = pnand %p1914_p3, %p1908_p0 }
   0xc   :  { %1918 = shalt.err (!%p1915_p4)
}
   0xd   :  { %25 = dma.hbm_to_vmem [thread:$0]  %s2948_s0, 512, %s23_s22, [#allocation5]  }
   0xe   :  { %s1927_s28 = scalar_lea.vmem %s36_s24, 8192  ;;  %p1932_p6 = scmp.lt.s32.totalorder %s36_s24, %s36_s24 }
   0xf   :  { %p1928_p5 = scmp.ne.s32.totalorder %s36_s24, %s1927_s28  ;;  %p1933_p7 = scmp.lt.s32.totalorder %s1927_s28, %s1927_s28 }
  0x11   :  { %p1934_p8 = por %p1933_p7, %p1932_p6 }
  0x13   :  { %p1935_p9 = pnand %p1934_p8, %p1928_p5 }
  0x15   :  { %1938 = shalt.err (!%p1935_p9)
}
  0x16   :  { %s2009_s29 = smov 512   ;;  %s2010_s30 = smov 32  }
  0x17   :  { %41 = dma.hbm_to_vmem [thread:$0]  %s2951_s3, 8192, %s36_s24, [#allocation8], %s2009_s29, %s2009_s29, %s2010_s30  }
  0x18   :  { %1999 = dma.done.wait [#allocation5], 512  }
  0x19   :  { %2000 = vsyncadd [#allocation5], 4294966784 }
  0x1a   :  { %2001 = dma.done.wait [#allocation8], 8192  }
  0x1b   :  { %2002 = vsyncadd [#allocation8], 4294959104  ;;  %v2955_v0 = vmov 0.0   ;;  %v2058_v1 = vld [vmem:[#allocation7 + $0x1e8] sm:$0xff]  ;;  %v2060_v2 = vld [vmem:[#allocation7 + $0x1e0] sm:$0xff]  ;;  %vm1609_vm0 = vcmask 1040384  }
  0x1c   :  { %190 = vmatprep.mubr.f32.mxu0 %v2955_v0  ;;  %261 = vmatprep.mubr.f32.mxu1 %v2955_v0  ;;  %3059 = vst [vmem:[#allocation17_spill] sm:$0xff] %v2058_v1  ;;  %v2062_v3 = vld [vmem:[#allocation7 + $0x1c8] sm:$0xff]  ;;  %v2065_v4 = vld [vmem:[#allocation7 + $0x1c0] sm:$0xff]  ;;  %v2079_v9 = vld [vmem:[#allocation7 + $0x1f8] sm:$0xff]  ;;  %vm1611_vm1 = vcmask 1041408   ;;  %vm1613_vm2 = vcmask 1042432  }
  0x1d   :  { %126 = vmatprep.subr.mxu0 %v2058_v1  ;;  %v2068_v5 = vld [vmem:[#allocation7 + $0x1a8] sm:$0xff]  ;;  %v2071_v6 = vld [vmem:[#allocation7 + $0x1a0] sm:$0xff]  ;;  %3060 = vst [vmem:[#allocation18_spill] sm:$0xff] %v2079_v9  ;;  %197 = vmatprep.subr.mxu1 %v2079_v9  ;;  %v2085_v11 = vld [vmem:[#allocation7 + $0x1f0] sm:$0xff]  ;;  %vm1615_vm3 = vcmask 1043456   ;;  %vm1617_vm4 = vcmask 1044480  }
  0x1e   :  { %127 = vmatpush1.msra.mxu0 %v2060_v2  ;;  %v2074_v7 = vld [vmem:[#allocation7 + $0x188] sm:$0xff]  ;;  %v2077_v8 = vld [vmem:[#allocation7 + $0x180] sm:$0xff]  ;;  %198 = vmatpush1.msra.mxu1 %v2085_v11  ;;  %v2091_v13 = vld [vmem:[#allocation7 + $0x1d8] sm:$0xff]  ;;  %vm1619_vm5 = vcmask 1045504   ;;  %s2013_s11 = smov [#allocation9]   ;;  %vm1621_vm6 = vcmask 1046528  }
  0x1f   :  { %128 = vmatprep.subr.mxu0 %v2062_v3  ;;  %v2082_v10 = vld [vmem:[#allocation7 + $0x168] sm:$0xff]  ;;  %v2088_v12 = vld [vmem:[#allocation7 + $0x160] sm:$0xff]  ;;  %v2093_v14 = vld [vmem:[#allocation7 + $0x1d0] sm:$0xff]  ;;  %199 = vmatprep.subr.mxu1 %v2091_v13  ;;  %s1634_s12 = sshll.u32 %s2013_s11, 4  ;;  %s2014_s13 = smov [#allocation12]   ;;  %s1635_s12 = int_to_ptr.vmem [resolvable:$true] %s1634_s12 }
  0x20   :  { %129 = vmatpush1.msra.mxu0 %v2065_v4  ;;  %v2096_v15 = vld [vmem:[#allocation7 + $0x148] sm:$0xff]  ;;  %v2099_v16 = vld [vmem:[#allocation7 + $0x1b8] sm:$0xff]  ;;  %v2102_v17 = vld [vmem:[#allocation7 + $0x140] sm:$0xff]  ;;  %200 = vmatpush1.msra.mxu1 %v2093_v14  ;;  %s1654_s14 = sshll.u32 %s2014_s13, 4  ;;  %s1655_s14 = int_to_ptr.vmem [resolvable:$true] %s1654_s14 }
  0x21   :  { %130 = vmatprep.subr.mxu0 %v2068_v5  ;;  %v2105_v18 = vld [vmem:[#allocation7 + $0x1b0] sm:$0xff]  ;;  %v2107_v19 = vld [vmem:[#allocation7 + $0x198] sm:$0xff]  ;;  %v2110_v20 = vld [vmem:[#allocation7 + $0x128] sm:$0xff]  ;;  %201 = vmatprep.subr.mxu1 %v2099_v16 }
  0x22   :  { %131 = vmatpush1.msra.mxu0 %v2071_v6  ;;  %v2113_v21 = vld [vmem:[#allocation7 + $0x190] sm:$0xff]  ;;  %v2116_v22 = vld [vmem:[#allocation7 + $0x120] sm:$0xff]  ;;  %202 = vmatpush1.msra.mxu1 %v2105_v18  ;;  %v2119_v23 = vld [vmem:[#allocation7 + $0x178] sm:$0xff] }
  0x23   :  { %132 = vmatprep.subr.mxu0 %v2074_v7  ;;  %v2122_v24 = vld [vmem:[#allocation7 + $0x108] sm:$0xff]  ;;  %203 = vmatprep.subr.mxu1 %v2107_v19  ;;  %v2125_v25 = vld [vmem:[#allocation7 + $0x170] sm:$0xff]  ;;  %v2128_v26 = vld [vmem:[#allocation7 + $0x100] sm:$0xff] }
  0x24   :  { %133 = vmatpush1.msra.mxu0 %v2077_v8  ;;  %204 = vmatpush1.msra.mxu1 %v2113_v21  ;;  %v2131_v27 = vld [vmem:[#allocation7 + $0x158] sm:$0xff]  ;;  %v2134_v28 = vld [vmem:[#allocation7 + $0xe8] sm:$0xff]  ;;  %v2137_v29 = vld [vmem:[#allocation7 + $0x150] sm:$0xff] }
  0x25   :  { %134 = vmatprep.subr.mxu0 %v2082_v10  ;;  %205 = vmatprep.subr.mxu1 %v2119_v23  ;;  %v2140_v30 = vld [vmem:[#allocation7 + $0xe0] sm:$0xff]  ;;  %v2143_v31 = vld [vmem:[#allocation7 + $0x138] sm:$0xff]  ;;  %v2146_v32 = vld [vmem:[#allocation7 + $0xc8] sm:$0xff] }
  0x26   :  { %135 = vmatpush1.msra.mxu0 %v2088_v12  ;;  %206 = vmatpush1.msra.mxu1 %v2125_v25  ;;  %v2149_v33 = vld [vmem:[#allocation7 + $0x130] sm:$0xff]  ;;  %v52_v34 = vld [vmem:[%s2949_s1] sm:$0x1]  ;;  %v2155_v35 = vld [vmem:[#allocation7 + $0xc0] sm:$0xff] }
  0x27   :  { %136 = vmatprep.subr.mxu0 %v2096_v15  ;;  %207 = vmatprep.subr.mxu1 %v2131_v27  ;;  %v2158_v36 = vld [vmem:[#allocation7 + $0x118] sm:$0xff]  ;;  %53 = vst [vmem:[#allocation2] sm:$0x1] %v52_v34  ;;  %v2161_v37 = vld [vmem:[#allocation7 + $0xa8] sm:$0xff]  ;;  %v2164_v38 = vld [vmem:[#allocation7 + $0x110] sm:$0xff] }
  0x28   :  { %137 = vmatpush1.msra.mxu0 %v2102_v17  ;;  %208 = vmatpush1.msra.mxu1 %v2137_v29  ;;  %v2167_v39 = vld [vmem:[#allocation7 + $0xa0] sm:$0xff]  ;;  %v2170_v40 = vld [vmem:[#allocation7 + $0xf8] sm:$0xff]  ;;  %v2173_v41 = vld [vmem:[#allocation7 + $0x88] sm:$0xff] }
  0x29   :  { %138 = vmatprep.subr.mxu0 %v2110_v20  ;;  %209 = vmatprep.subr.mxu1 %v2143_v31  ;;  %3061 = vst [vmem:[#allocation19_spill] sm:$0xff] %v2173_v41  ;;  %v2176_v42 = vld [vmem:[#allocation7 + $0xf0] sm:$0xff]  ;;  %v2179_v43 = vld [vmem:[#allocation7 + $0x80] sm:$0xff]  ;;  %v2182_v44 = vld [vmem:[#allocation7 + $0xd8] sm:$0xff] }
  0x2a   :  { %139 = vmatpush1.msra.mxu0 %v2116_v22  ;;  %210 = vmatpush1.msra.mxu1 %v2149_v33  ;;  %3062 = vst [vmem:[#allocation20_spill] sm:$0xff] %v2179_v43  ;;  %v2185_v45 = vld [vmem:[#allocation7 + $0x68] sm:$0xff]  ;;  %v2188_v46 = vld [vmem:[#allocation7 + $0xd0] sm:$0xff]  ;;  %v2191_v47 = vld [vmem:[#allocation7 + $0x60] sm:$0xff] }
  0x2b   :  { %140 = vmatprep.subr.mxu0 %v2122_v24  ;;  %211 = vmatprep.subr.mxu1 %v2158_v36  ;;  %3063 = vst [vmem:[#allocation21_spill] sm:$0xff] %v2185_v45  ;;  %3064 = vst [vmem:[#allocation22_spill] sm:$0xff] %v2191_v47  ;;  %v2194_v48 = vld [vmem:[#allocation7 + $0xb8] sm:$0xff]  ;;  %v2197_v49 = vld [vmem:[#allocation7 + $0x48] sm:$0xff] }
  0x2c   :  { %141 = vmatpush1.msra.mxu0 %v2128_v26  ;;  %212 = vmatpush1.msra.mxu1 %v2164_v38  ;;  %3065 = vst [vmem:[#allocation23_spill] sm:$0xff] %v2197_v49  ;;  %v2200_v50 = vld [vmem:[#allocation7 + $0xb0] sm:$0xff]  ;;  %v2203_v51 = vld [vmem:[#allocation7 + $0x40] sm:$0xff]  ;;  %v2206_v52 = vld [vmem:[#allocation7 + $0x98] sm:$0xff] }
  0x2d   :  { %142 = vmatprep.subr.mxu0 %v2134_v28  ;;  %213 = vmatprep.subr.mxu1 %v2170_v40  ;;  %3066 = vst [vmem:[#allocation24_spill] sm:$0xff] %v2200_v50  ;;  %3067 = vst [vmem:[#allocation25_spill] sm:$0xff] %v2203_v51  ;;  %v2209_v53 = vld [vmem:[#allocation7 + $0x28] sm:$0xff]  ;;  %v2212_v54 = vld [vmem:[#allocation7 + $0x90] sm:$0xff] }
  0x2e   :  { %143 = vmatpush1.msra.mxu0 %v2140_v30  ;;  %214 = vmatpush1.msra.mxu1 %v2176_v42  ;;  %3068 = vst [vmem:[#allocation26_spill] sm:$0xff] %v2206_v52  ;;  %3069 = vst [vmem:[#allocation27_spill] sm:$0xff] %v2209_v53  ;;  %v2215_v55 = vld [vmem:[#allocation7 + $0x20] sm:$0xff]  ;;  %v2218_v56 = vld [vmem:[#allocation7 + $0x78] sm:$0xff] }
  0x2f   :  { %144 = vmatprep.subr.mxu0 %v2146_v32  ;;  %215 = vmatprep.subr.mxu1 %v2182_v44  ;;  %3070 = vst [vmem:[#allocation28_spill] sm:$0xff] %v2212_v54  ;;  %3071 = vst [vmem:[#allocation29_spill] sm:$0xff] %v2215_v55  ;;  %v2221_v57 = vld [vmem:[#allocation7 + $0x8] sm:$0xff]  ;;  %v2224_v58 = vld [vmem:[#allocation7 + $0x70] sm:$0xff] }
  0x30   :  { %145 = vmatpush1.msra.mxu0 %v2155_v35  ;;  %216 = vmatpush1.msra.mxu1 %v2188_v46  ;;  %3072 = vst [vmem:[#allocation30_spill] sm:$0xff] %v2218_v56  ;;  %3073 = vst [vmem:[#allocation31_spill] sm:$0xff] %v2221_v57  ;;  %v2227_v59 = vld [vmem:[#allocation7] sm:$0xff]  ;;  %v2230_v60 = vld [vmem:[#allocation7 + $0x58] sm:$0xff] }
  0x31   :  { %146 = vmatprep.subr.mxu0 %v2161_v37  ;;  %217 = vmatprep.subr.mxu1 %v2194_v48  ;;  %3074 = vst [vmem:[#allocation32_spill] sm:$0xff] %v2224_v58  ;;  %3075 = vst [vmem:[#allocation33_spill] sm:$0xff] %v2227_v59  ;;  %v120_v61 = vld [vmem:[#allocation2] sm:$0x1]  ;;  %v2234_v62 = vld [vmem:[#allocation7 + $0x50] sm:$0xff] }
  0x32   :  { %147 = vmatpush1.msra.mxu0 %v2167_v39  ;;  %218 = vmatpush1.msra.mxu1 %v2200_v50  ;;  %3076 = vst [vmem:[#allocation34_spill] sm:$0xff] %v2230_v60  ;;  %3077 = vst [vmem:[#allocation35_spill] sm:$0xff] %v2234_v62  ;;  %v2238_v63 = vld [vmem:[#allocation7 + $0x38] sm:$0xff]  ;;  %v2242_v34 = vld [vmem:[#allocation7 + $0x30] sm:$0xff] }
  0x33   :  { %148 = vmatprep.subr.mxu0 %v2173_v41  ;;  %219 = vmatprep.subr.mxu1 %v2206_v52  ;;  %3078 = vst [vmem:[#allocation36_spill] sm:$0xff] %v2238_v63  ;;  %3079 = vst [vmem:[#allocation37_spill] sm:$0xff] %v2242_v34  ;;  %v2245_v0 = vld [vmem:[#allocation7 + $0x18] sm:$0xff] }
  0x34   :  { %149 = vmatpush1.msra.mxu0 %v2179_v43  ;;  %220 = vmatpush1.msra.mxu1 %v2212_v54  ;;  %3080 = vst [vmem:[#allocation38_spill] sm:$0xff] %v2245_v0 }
  0x35   :  { %150 = vmatprep.subr.mxu0 %v2185_v45  ;;  %221 = vmatprep.subr.mxu1 %v2218_v56 }
  0x36   :  { %151 = vmatpush1.msra.mxu0 %v2191_v47  ;;  %222 = vmatpush1.msra.mxu1 %v2224_v58 }
  0x37   :  { %152 = vmatprep.subr.mxu0 %v2197_v49  ;;  %223 = vmatprep.subr.mxu1 %v2230_v60 }
  0x38   :  { %153 = vmatpush1.msra.mxu0 %v2203_v51  ;;  %224 = vmatpush1.msra.mxu1 %v2234_v62 }
  0x39   :  { %154 = vmatprep.subr.mxu0 %v2209_v53  ;;  %225 = vmatprep.subr.mxu1 %v2238_v63 }
  0x3a   :  { %155 = vmatpush1.msra.mxu0 %v2215_v55  ;;  %v2248_v55 = vld [vmem:[#allocation7 + $0x10] sm:$0xff]  ;;  %226 = vmatpush1.msra.mxu1 %v2242_v34 }
  0x3b   :  { %156 = vmatprep.subr.mxu0 %v2221_v57  ;;  %3081 = vst [vmem:[#allocation39_spill] sm:$0xff] %v2248_v55  ;;  %227 = vmatprep.subr.mxu1 %v2245_v0 }
  0x3c   :  { %157 = vmatpush1.msra.mxu0 %v2227_v59  ;;  %228 = vmatpush1.msra.mxu1 %v2248_v55 }
  0x3d   :  { %191 = vmatmul.mubr.f32.vlgmr.msra.gmra.mxu0 %v120_v61  ;;  %296 = vmatprep.subr.mxu0 %v2058_v1 }
  0x3e   :  { %297 = vmatpush1.msra.mxu0 %v2060_v2  ;;  %262 = vmatmul.mubr.f32.vlgmr.msra.gmra.mxu1 %v120_v61  ;;  %v3082_v61 = vld [vmem:[#allocation29_spill] sm:$0xff] }
  0x3f   :  { %298 = vmatprep.subr.mxu0 %v2062_v3  ;;  %367 = vmatprep.subr.mxu1 %v2079_v9 }
  0x40   :  { %299 = vmatpush1.msra.mxu0 %v2065_v4  ;;  %368 = vmatpush1.msra.mxu1 %v2085_v11 }
  0x41   :  { %300 = vmatprep.subr.mxu0 %v2068_v5  ;;  %369 = vmatprep.subr.mxu1 %v2091_v13 }
  0x42   :  { %301 = vmatpush1.msra.mxu0 %v2071_v6  ;;  %370 = vmatpush1.msra.mxu1 %v2093_v14 }
  0x43   :  { %302 = vmatprep.subr.mxu0 %v2074_v7  ;;  %371 = vmatprep.subr.mxu1 %v2099_v16 }
  0x44   :  { %303 = vmatpush1.msra.mxu0 %v2077_v8  ;;  %372 = vmatpush1.msra.mxu1 %v2105_v18 }
  0x45   :  { %304 = vmatprep.subr.mxu0 %v2082_v10  ;;  %373 = vmatprep.subr.mxu1 %v2107_v19 }
  0x46   :  { %305 = vmatpush1.msra.mxu0 %v2088_v12  ;;  %374 = vmatpush1.msra.mxu1 %v2113_v21 }
  0x47   :  { %306 = vmatprep.subr.mxu0 %v2096_v15  ;;  %375 = vmatprep.subr.mxu1 %v2119_v23 }
  0x48   :  { %307 = vmatpush1.msra.mxu0 %v2102_v17  ;;  %376 = vmatpush1.msra.mxu1 %v2125_v25 }
  0x49   :  { %308 = vmatprep.subr.mxu0 %v2110_v20  ;;  %377 = vmatprep.subr.mxu1 %v2131_v27 }
  0x4a   :  { %309 = vmatpush1.msra.mxu0 %v2116_v22  ;;  %378 = vmatpush1.msra.mxu1 %v2137_v29 }
  0x4b   :  { %310 = vmatprep.subr.mxu0 %v2122_v24  ;;  %379 = vmatprep.subr.mxu1 %v2143_v31 }
  0x4c   :  { %311 = vmatpush1.msra.mxu0 %v2128_v26  ;;  %380 = vmatpush1.msra.mxu1 %v2149_v33 }
  0x4d   :  { %312 = vmatprep.subr.mxu0 %v2134_v28  ;;  %381 = vmatprep.subr.mxu1 %v2158_v36 }
  0x4e   :  { %313 = vmatpush1.msra.mxu0 %v2140_v30  ;;  %382 = vmatpush1.msra.mxu1 %v2164_v38 }
  0x4f   :  { %314 = vmatprep.subr.mxu0 %v2146_v32  ;;  %383 = vmatprep.subr.mxu1 %v2170_v40 }
  0x50   :  { %315 = vmatpush1.msra.mxu0 %v2155_v35  ;;  %384 = vmatpush1.msra.mxu1 %v2176_v42 }
  0x51   :  { %316 = vmatprep.subr.mxu0 %v2161_v37  ;;  %385 = vmatprep.subr.mxu1 %v2182_v44 }
  0x52   :  { %317 = vmatpush1.msra.mxu0 %v2167_v39  ;;  %386 = vmatpush1.msra.mxu1 %v2188_v46 }
  0x53   :  { %318 = vmatprep.subr.mxu0 %v2173_v41  ;;  %387 = vmatprep.subr.mxu1 %v2194_v48 }
  0x54   :  { %319 = vmatpush1.msra.mxu0 %v2179_v43  ;;  %388 = vmatpush1.msra.mxu1 %v2200_v50 }
  0x55   :  { %320 = vmatprep.subr.mxu0 %v2185_v45  ;;  %389 = vmatprep.subr.mxu1 %v2206_v52 }
  0x56   :  { %321 = vmatpush1.msra.mxu0 %v2191_v47  ;;  %390 = vmatpush1.msra.mxu1 %v2212_v54 }
  0x57   :  { %322 = vmatprep.subr.mxu0 %v2197_v49  ;;  %391 = vmatprep.subr.mxu1 %v2218_v56  ;;  %v3083_v49 = vmov 0.0  }
  0x58   :  { %323 = vmatpush1.msra.mxu0 %v2203_v51  ;;  %392 = vmatpush1.msra.mxu1 %v2224_v58 }
  0x59   :  { %324 = vmatprep.subr.mxu0 %v2209_v53  ;;  %393 = vmatprep.subr.mxu1 %v2230_v60 }
  0x5a   :  { %325 = vmatpush1.msra.mxu0 %v3082_v61  ;;  %394 = vmatpush1.msra.mxu1 %v2234_v62  ;;  %v2326_v61 = vld [vmem:[#allocation4 + $0x8] sm:$0xff] }
  0x5b   :  { %326 = vmatprep.subr.mxu0 %v2221_v57  ;;  %395 = vmatprep.subr.mxu1 %v2238_v63  ;;  %v54_v57 = vld [vmem:[%s2950_s2] sm:$0x1]  ;;  %3085 = vst [vmem:[#allocation41_spill] sm:$0xff] %v2326_v61  ;;  %s2012_s2 = smov [#allocation10]  }
  0x5c   :  { %327 = vmatpush1.msra.mxu0 %v2227_v59  ;;  %396 = vmatpush1.msra.mxu1 %v2242_v34  ;;  %55 = vst [vmem:[#allocation3] sm:$0x1] %v54_v57  ;;  %v2324_v59 = vld [vmem:[#allocation4] sm:$0xff]  ;;  %v2333_v57 = vld [vmem:[#allocation4 + $0x18] sm:$0xff]  ;;  %s1644_s10 = sshll.u32 %s2012_s2, 4  ;;  %s1645_s10 = int_to_ptr.vmem [resolvable:$true] %s1644_s10 }
  0x5d   :  { %360 = vmatprep.mubr.f32.mxu0 %v3083_v49  ;;  %397 = vmatprep.subr.mxu1 %v2245_v0  ;;  %3084 = vst [vmem:[#allocation40_spill] sm:$0xff] %v2324_v59  ;;  %s1939_s15 = scalar_lea.vmem %s1645_s10, 16  ;;  %s1943_s16 = scalar_lea.vmem %s1645_s10, 32 }
  0x5e   :  { %431 = vmatprep.mubr.f32.mxu1 %v3083_v49  ;;  %398 = vmatpush1.msra.mxu1 %v2248_v55  ;;  %p1940_p10 = scmp.ne.s32.totalorder %s1645_s10, %s1939_s15  ;;  %p1944_p11 = scmp.lt.s32.totalorder %s1645_s10, %s1645_s10 }
  0x5f   :  { %484 = vmatprep.subr.mxu0 %v2058_v1  ;;  %555 = vmatprep.subr.mxu1 %v2079_v9  ;;  %v2330_v9 = vld [vmem:[#allocation4 + $0x10] sm:$0xff]  ;;  %p1945_p12 = scmp.lt.s32.totalorder %s1943_s16, %s1939_s15 }
  0x60   :  { %3086 = vst [vmem:[#allocation42_spill] sm:$0xff] %v2330_v9 }
  0x61   :  { %p1946_p13 = por %p1945_p12, %p1944_p11 }
  0x63   :  { %p1947_p0 = pnand %p1946_p13, %p1940_p10 }
  0xfd   :  { %v192_v34 = vpop.f32.mrf.mxu0 }
  0xfe   :  { %v268_v0 = vadd.f32 %v192_v34, %v2324_v59  ;;  %v263_v53 = vpop.f32.mrf.mxu1 }
  0xff   :  { %v194_v63 = vpop.f32.mrf.mxu0  ;;  %v270_v62 = vadd.f32 %v263_v53, %v2330_v9 }
 0x100   :  { %v1671_v49 = vmul.f32 -1.442695, %v268_v0  ;;  %v269_v55 = vadd.f32 %v194_v63, %v2326_v61  ;;  %v265_v51 = vpop.f32.mrf.mxu1  ;;  %v121_v61 = vld [vmem:[#allocation3] sm:$0x1] }
 0x101   :  { %v1673_v60 = vmul.f32 -1.442695, %v270_v62  ;;  %v271_v58 = vadd.f32 %v265_v51, %v2333_v57  ;;  %v3092_v62 = vld [vmem:[#allocation23_spill] sm:$0xff] }
 0x102   :  { %1703 = vpow2.f32 %v1671_v49  ;;  %v1672_v1 = vmul.f32 -1.442695, %v269_v55 }
 0x104   :  { %1705 = vpow2.f32 %v1672_v1 }
 0x105   :  { %1707 = vpow2.f32 %v1673_v60 }
 0x106   :  { %1709 = vtanh.f32 %v271_v58  ;;  %v3090_v58 = vld [vmem:[#allocation22_spill] sm:$0xff] }
 0x10f   :  { %v1704_v47 = vpop.eup %1703 }
 0x110   :  { %v281_v34 = vadd.f32 1.0, %v1704_v47 }
 0x111   :  { %v1706_v0 = vpop.eup %1705 }
 0x112   :  { %1711 = vrcp.f32 %v281_v34  ;;  %v282_v49 = vadd.f32 1.0, %v1706_v0  ;;  %v1708_v1 = vpop.eup %1707  ;;  %v3094_v34 = vld [vmem:[#allocation25_spill] sm:$0xff]  ;;  %v3095_v0 = vld [vmem:[#allocation35_spill] sm:$0xff] }
 0x113   :  { %v1710_v55 = vpop.eup %1709  ;;  %v283_v53 = vadd.f32 1.0, %v1708_v1  ;;  %v3097_v1 = vld [vmem:[#allocation36_spill] sm:$0xff] }
 0x114   :  { %1713 = vrcp.f32 %v282_v49  ;;  %v3096_v49 = vld [vmem:[#allocation27_spill] sm:$0xff] }
 0x115   :  { %1715 = vrcp.f32 %v283_v53  ;;  %v3100_v53 = vld [vmem:[#allocation31_spill] sm:$0xff] }
 0x11f   :  { %v1712_v63 = vpop.eup %1711 }
 0x120   :  { %v292_v56 = vmul.f32 %v1712_v63, %v1710_v55  ;;  %v3098_v55 = vld [vmem:[#allocation29_spill] sm:$0xff] }
 0x121   :  { %v1714_v59 = vpop.eup %1713  ;;  %v3099_v63 = vld [vmem:[#allocation37_spill] sm:$0xff] }
 0x122   :  { %v291_v9 = vmul.f32 %v1714_v59, %v121_v61  ;;  %v1716_v47 = vpop.eup %1715  ;;  %v3091_v59 = vld [vmem:[#allocation32_spill] sm:$0xff]  ;;  %v3093_v61 = vld [vmem:[#allocation34_spill] sm:$0xff] }
 0x124   :  { %v2336_v45 = vadd.f32 %v292_v56, %v291_v9  ;;  %v3088_v9 = vld [vmem:[#allocation21_spill] sm:$0xff]  ;;  %v3089_v56 = vld [vmem:[#allocation30_spill] sm:$0xff] }
 0x126   :  { %1717 = vtanh.f32 %v2336_v45 }
 0x133   :  { %v1718_v51 = vpop.eup %1717 }
 0x134   :  { %v2339_v60 = vmul.f32 %v1718_v51, %v1716_v47  ;;  %v3101_v47 = vld [vmem:[#allocation38_spill] sm:$0xff]  ;;  %v3102_v51 = vld [vmem:[#allocation33_spill] sm:$0xff] }
 0x136   :  { %3087 = vst [vmem:[#allocation43_spill] sm:$0xff] %v2339_v60  ;;  %361 = vmatmul.mubr.f32.vlgmr.msra.gmra.mxu0 %v2339_v60  ;;  %432 = vmatmul.mubr.f32.vlgmr.msra.gmra.mxu1 %v2339_v60  ;;  %v3103_v60 = vmov 0.0  }
 0x137   :  { %485 = vmatpush1.msra.mxu0 %v2060_v2  ;;  %556 = vmatpush1.msra.mxu1 %v2085_v11 }
 0x138   :  { %486 = vmatprep.subr.mxu0 %v2062_v3  ;;  %557 = vmatprep.subr.mxu1 %v2091_v13 }
 0x139   :  { %487 = vmatpush1.msra.mxu0 %v2065_v4  ;;  %558 = vmatpush1.msra.mxu1 %v2093_v14 }
 0x13a   :  { %488 = vmatprep.subr.mxu0 %v2068_v5  ;;  %559 = vmatprep.subr.mxu1 %v2099_v16 }
 0x13b   :  { %489 = vmatpush1.msra.mxu0 %v2071_v6  ;;  %560 = vmatpush1.msra.mxu1 %v2105_v18 }
 0x13c   :  { %490 = vmatprep.subr.mxu0 %v2074_v7  ;;  %561 = vmatprep.subr.mxu1 %v2107_v19 }
 0x13d   :  { %491 = vmatpush1.msra.mxu0 %v2077_v8  ;;  %562 = vmatpush1.msra.mxu1 %v2113_v21 }
 0x13e   :  { %492 = vmatprep.subr.mxu0 %v2082_v10  ;;  %563 = vmatprep.subr.mxu1 %v2119_v23 }
 0x13f   :  { %493 = vmatpush1.msra.mxu0 %v2088_v12  ;;  %564 = vmatpush1.msra.mxu1 %v2125_v25 }
 0x140   :  { %494 = vmatprep.subr.mxu0 %v2096_v15  ;;  %565 = vmatprep.subr.mxu1 %v2131_v27 }
 0x141   :  { %495 = vmatpush1.msra.mxu0 %v2102_v17  ;;  %566 = vmatpush1.msra.mxu1 %v2137_v29 }
 0x142   :  { %496 = vmatprep.subr.mxu0 %v2110_v20  ;;  %567 = vmatprep.subr.mxu1 %v2143_v31 }
 0x143   :  { %497 = vmatpush1.msra.mxu0 %v2116_v22  ;;  %568 = vmatpush1.msra.mxu1 %v2149_v33 }
 0x144   :  { %498 = vmatprep.subr.mxu0 %v2122_v24  ;;  %569 = vmatprep.subr.mxu1 %v2158_v36 }
 0x145   :  { %499 = vmatpush1.msra.mxu0 %v2128_v26  ;;  %570 = vmatpush1.msra.mxu1 %v2164_v38 }
 0x146   :  { %500 = vmatprep.subr.mxu0 %v2134_v28  ;;  %571 = vmatprep.subr.mxu1 %v2170_v40 }
 0x147   :  { %501 = vmatpush1.msra.mxu0 %v2140_v30  ;;  %572 = vmatpush1.msra.mxu1 %v2176_v42 }
 0x148   :  { %502 = vmatprep.subr.mxu0 %v2146_v32  ;;  %573 = vmatprep.subr.mxu1 %v2182_v44 }
 0x149   :  { %503 = vmatpush1.msra.mxu0 %v2155_v35  ;;  %574 = vmatpush1.msra.mxu1 %v2188_v46 }
 0x14a   :  { %504 = vmatprep.subr.mxu0 %v2161_v37  ;;  %575 = vmatprep.subr.mxu1 %v2194_v48 }
 0x14b   :  { %505 = vmatpush1.msra.mxu0 %v2167_v39  ;;  %576 = vmatpush1.msra.mxu1 %v2200_v50 }
 0x14c   :  { %506 = vmatprep.subr.mxu0 %v2173_v41  ;;  %577 = vmatprep.subr.mxu1 %v2206_v52 }
 0x14d   :  { %507 = vmatpush1.msra.mxu0 %v2179_v43  ;;  %578 = vmatpush1.msra.mxu1 %v2212_v54 }
 0x14e   :  { %508 = vmatprep.subr.mxu0 %v3088_v9  ;;  %579 = vmatprep.subr.mxu1 %v3089_v56 }
 0x14f   :  { %509 = vmatpush1.msra.mxu0 %v3090_v58  ;;  %580 = vmatpush1.msra.mxu1 %v3091_v59 }
 0x150   :  { %510 = vmatprep.subr.mxu0 %v3092_v62  ;;  %581 = vmatprep.subr.mxu1 %v3093_v61  ;;  %v3104_v61 = vld [vmem:[#allocation39_spill] sm:$0xff] }
 0x151   :  { %511 = vmatpush1.msra.mxu0 %v3094_v34  ;;  %582 = vmatpush1.msra.mxu1 %v3095_v0  ;;  %v3105_v0 = vld [vmem:[#allocation17_spill] sm:$0xff] }
 0x152   :  { %512 = vmatprep.subr.mxu0 %v3096_v49  ;;  %583 = vmatprep.subr.mxu1 %v3097_v1  ;;  %v3106_v49 = vld [vmem:[#allocation18_spill] sm:$0xff] }
 0x153   :  { %513 = vmatpush1.msra.mxu0 %v3098_v55  ;;  %584 = vmatpush1.msra.mxu1 %v3099_v63  ;;  %v3107_v63 = vld [vmem:[#allocation40_spill] sm:$0xff] }
 0x154   :  { %514 = vmatprep.subr.mxu0 %v3100_v53  ;;  %585 = vmatprep.subr.mxu1 %v3101_v47  ;;  %v3108_v47 = vld [vmem:[#allocation41_spill] sm:$0xff] }
 0x155   :  { %515 = vmatpush1.msra.mxu0 %v3102_v51  ;;  %548 = vmatprep.mubr.f32.mxu0 %v3103_v60 }
 0x156   :  { %586 = vmatpush1.msra.mxu1 %v3104_v61  ;;  %619 = vmatprep.mubr.f32.mxu1 %v3103_v60  ;;  %v3109_v60 = vld [vmem:[#allocation42_spill] sm:$0xff] }
 0x157   :  { %672 = vmatprep.subr.mxu0 %v3105_v0  ;;  %743 = vmatprep.subr.mxu1 %v3106_v49 }
 0x1f6   :  { %v362_v1 = vpop.f32.mrf.mxu0  ;;  %v433_v51 = vpop.f32.mrf.mxu1 }
 0x1f7   :  { %v442_v55 = vrot.slane %v362_v1, 7  ;;  %v444_v61 = vrot.slane %v433_v51, 7  ;;  %v3112_v51 = vld [vmem:[#allocation20_spill] sm:$0xff] }
 0x1f8   :  { %v364_v34 = vpop.f32.mrf.mxu0  ;;  %v435_v9 = vpop.f32.mrf.mxu1 }
 0x1f9   :  { %v450_v62 = vadd.f32 %v442_v55, %v3107_v63  ;;  %v443_v53 = vrot.slane %v364_v34, 7  ;;  %v452_v54 = vadd.f32 %v444_v61, %v3109_v60  ;;  %v445_v0 = vrot.slane %v435_v9, 7 }
 0x1fb   :  { %v1674_v59 = vmul.f32 -1.442695, %v450_v62  ;;  %v451_v58 = vadd.f32 %v443_v53, %v3108_v47  ;;  %v1676_v43 = vmul.f32 -1.442695, %v452_v54  ;;  %v453_v1 = vadd.f32 %v445_v0, %v2333_v57 }
 0x1fd   :  { %1719 = vpow2.f32 %v1674_v59  ;;  %v1675_v56 = vmul.f32 -1.442695, %v451_v58 }
 0x1ff   :  { %1721 = vpow2.f32 %v1675_v56  ;;  %v474_v56 = vrot.slane %v2336_v45, 7  ;;  %v3110_v45 = vld [vmem:[#allocation19_spill] sm:$0xff] }
 0x200   :  { %1723 = vpow2.f32 %v1676_v43 }
 0x20a   :  { %v1720_v49 = vpop.eup %1719 }
 0x20b   :  { %v463_v52 = vadd.f32 1.0, %v1720_v49  ;;  %v3111_v49 = vld [vmem:[#allocation26_spill] sm:$0xff] }
 0x20c   :  { %v1722_v41 = vpop.eup %1721 }
 0x20d   :  { %1725 = vrcp.f32 %v463_v52  ;;  %v464_v62 = vadd.f32 1.0, %v1722_v41  ;;  %v1724_v59 = vpop.eup %1723 }
 0x20e   :  { %1727 = vtanh.f32 %v453_v1  ;;  %v465_v53 = vadd.f32 1.0, %v1724_v59  ;;  %v3113_v1 = vld [vmem:[#allocation28_spill] sm:$0xff]  ;;  %v3115_v59 = vld [vmem:[#allocation30_spill] sm:$0xff] }
 0x20f   :  { %1729 = vrcp.f32 %v464_v62  ;;  %v3114_v62 = vld [vmem:[#allocation21_spill] sm:$0xff] }
 0x210   :  { %1731 = vrcp.f32 %v465_v53  ;;  %v3120_v53 = vld [vmem:[#allocation25_spill] sm:$0xff] }
 0x21a   :  { %v1726_v34 = vpop.eup %1725 }
 0x21b   :  { %v1728_v58 = vpop.eup %1727 }
 0x21c   :  { %v1730_v55 = vpop.eup %1729  ;;  %v477_v9 = vmul.f32 %v1728_v58, %v1726_v34  ;;  %v3116_v34 = vld [vmem:[#allocation22_spill] sm:$0xff]  ;;  %v3117_v58 = vld [vmem:[#allocation32_spill] sm:$0xff] }
 0x21d   :  { %v476_v61 = vmul.f32 %v1730_v55, %v474_v56  ;;  %v1732_v0 = vpop.eup %1731  ;;  %v3118_v56 = vld [vmem:[#allocation23_spill] sm:$0xff]  ;;  %v3119_v55 = vld [vmem:[#allocation34_spill] sm:$0xff] }
 0x21f   :  { %v2414_v54 = vadd.f32 %v477_v9, %v476_v61  ;;  %v3121_v61 = vld [vmem:[#allocation35_spill] sm:$0xff] }
 0x220   :  { %v3122_v9 = vld [vmem:[#allocation27_spill] sm:$0xff] }
 0x221   :  { %1733 = vtanh.f32 %v2414_v54 }
 0x22e   :  { %v1734_v43 = vpop.eup %1733 }
 0x22f   :  { %v2417_v52 = vmul.f32 %v1734_v43, %v1732_v0  ;;  %v3123_v0 = vld [vmem:[#allocation36_spill] sm:$0xff]  ;;  %v3124_v43 = vld [vmem:[#allocation29_spill] sm:$0xff] }
 0x231   :  { %v482_v41 = vrot.slane %v2417_v52, 1 }
 0x233   :  { %549 = vmatmul.mubr.f32.vlgmr.msra.gmra.mxu0 %v482_v41  ;;  %620 = vmatmul.mubr.f32.vlgmr.msra.gmra.mxu1 %v482_v41  ;;  %v3125_v41 = vld [vmem:[#allocation37_spill] sm:$0xff] }
 0x234   :  { %673 = vmatpush1.msra.mxu0 %v2060_v2  ;;  %744 = vmatpush1.msra.mxu1 %v2085_v11 }
 0x235   :  { %674 = vmatprep.subr.mxu0 %v2062_v3  ;;  %745 = vmatprep.subr.mxu1 %v2091_v13 }
 0x236   :  { %675 = vmatpush1.msra.mxu0 %v2065_v4  ;;  %746 = vmatpush1.msra.mxu1 %v2093_v14 }
 0x237   :  { %676 = vmatprep.subr.mxu0 %v2068_v5  ;;  %747 = vmatprep.subr.mxu1 %v2099_v16 }
 0x238   :  { %677 = vmatpush1.msra.mxu0 %v2071_v6  ;;  %748 = vmatpush1.msra.mxu1 %v2105_v18 }
 0x239   :  { %678 = vmatprep.subr.mxu0 %v2074_v7  ;;  %749 = vmatprep.subr.mxu1 %v2107_v19 }
 0x23a   :  { %679 = vmatpush1.msra.mxu0 %v2077_v8  ;;  %750 = vmatpush1.msra.mxu1 %v2113_v21 }
 0x23b   :  { %680 = vmatprep.subr.mxu0 %v2082_v10  ;;  %751 = vmatprep.subr.mxu1 %v2119_v23 }
 0x23c   :  { %681 = vmatpush1.msra.mxu0 %v2088_v12  ;;  %752 = vmatpush1.msra.mxu1 %v2125_v25 }
 0x23d   :  { %682 = vmatprep.subr.mxu0 %v2096_v15  ;;  %753 = vmatprep.subr.mxu1 %v2131_v27 }
 0x23e   :  { %683 = vmatpush1.msra.mxu0 %v2102_v17  ;;  %754 = vmatpush1.msra.mxu1 %v2137_v29 }
 0x23f   :  { %684 = vmatprep.subr.mxu0 %v2110_v20  ;;  %755 = vmatprep.subr.mxu1 %v2143_v31 }
 0x240   :  { %685 = vmatpush1.msra.mxu0 %v2116_v22  ;;  %756 = vmatpush1.msra.mxu1 %v2149_v33 }
 0x241   :  { %686 = vmatprep.subr.mxu0 %v2122_v24  ;;  %757 = vmatprep.subr.mxu1 %v2158_v36 }
 0x242   :  { %687 = vmatpush1.msra.mxu0 %v2128_v26  ;;  %758 = vmatpush1.msra.mxu1 %v2164_v38 }
 0x243   :  { %688 = vmatprep.subr.mxu0 %v2134_v28  ;;  %759 = vmatprep.subr.mxu1 %v2170_v40 }
 0x244   :  { %689 = vmatpush1.msra.mxu0 %v2140_v30  ;;  %760 = vmatpush1.msra.mxu1 %v2176_v42 }
 0x245   :  { %690 = vmatprep.subr.mxu0 %v2146_v32  ;;  %761 = vmatprep.subr.mxu1 %v2182_v44 }
 0x246   :  { %691 = vmatpush1.msra.mxu0 %v2155_v35  ;;  %762 = vmatpush1.msra.mxu1 %v2188_v46 }
 0x247   :  { %692 = vmatprep.subr.mxu0 %v2161_v37  ;;  %763 = vmatprep.subr.mxu1 %v2194_v48 }
 0x248   :  { %693 = vmatpush1.msra.mxu0 %v2167_v39  ;;  %764 = vmatpush1.msra.mxu1 %v2200_v50 }
 0x249   :  { %694 = vmatprep.subr.mxu0 %v3110_v45  ;;  %765 = vmatprep.subr.mxu1 %v3111_v49 }
 0x24a   :  { %695 = vmatpush1.msra.mxu0 %v3112_v51  ;;  %766 = vmatpush1.msra.mxu1 %v3113_v1 }
 0x24b   :  { %696 = vmatprep.subr.mxu0 %v3114_v62  ;;  %767 = vmatprep.subr.mxu1 %v3115_v59  ;;  %v3126_v59 = vld [vmem:[#allocation31_spill] sm:$0xff] }
 0x24c   :  { %697 = vmatpush1.msra.mxu0 %v3116_v34  ;;  %768 = vmatpush1.msra.mxu1 %v3117_v58  ;;  %v3127_v34 = vld [vmem:[#allocation38_spill] sm:$0xff]  ;;  %v3128_v58 = vld [vmem:[#allocation33_spill] sm:$0xff] }
 0x24d   :  { %698 = vmatprep.subr.mxu0 %v3118_v56  ;;  %769 = vmatprep.subr.mxu1 %v3119_v55  ;;  %v3129_v56 = vmov 0.0   ;;  %v3130_v55 = vld [vmem:[#allocation39_spill] sm:$0xff] }
 0x24e   :  { %699 = vmatpush1.msra.mxu0 %v3120_v53  ;;  %770 = vmatpush1.msra.mxu1 %v3121_v61  ;;  %v3131_v61 = vld [vmem:[#allocation17_spill] sm:$0xff] }
 0x24f   :  { %700 = vmatprep.subr.mxu0 %v3122_v9  ;;  %771 = vmatprep.subr.mxu1 %v3123_v0  ;;  %v3132_v9 = vld [vmem:[#allocation18_spill] sm:$0xff] }
 0x250   :  { %701 = vmatpush1.msra.mxu0 %v3124_v43  ;;  %772 = vmatpush1.msra.mxu1 %v3125_v41 }
 0x251   :  { %702 = vmatprep.subr.mxu0 %v3126_v59  ;;  %773 = vmatprep.subr.mxu1 %v3127_v34 }
 0x252   :  { %703 = vmatpush1.msra.mxu0 %v3128_v58  ;;  %736 = vmatprep.mubr.f32.mxu0 %v3129_v56 }
 0x253   :  { %774 = vmatpush1.msra.mxu1 %v3130_v55  ;;  %807 = vmatprep.mubr.f32.mxu1 %v3129_v56 }
 0x254   :  { %860 = vmatprep.subr.mxu0 %v3131_v61  ;;  %931 = vmatprep.subr.mxu1 %v3132_v9 }
 0x2f3   :  { %v550_v0 = vpop.f32.mrf.mxu0  ;;  %v621_v58 = vpop.f32.mrf.mxu1 }
 0x2f4   :  { %v630_v43 = vrot.slane %v550_v0, 6  ;;  %v632_v55 = vrot.slane %v621_v58, 6 }
 0x2f5   :  { %v552_v53 = vpop.f32.mrf.mxu0  ;;  %v623_v51 = vpop.f32.mrf.mxu1 }
 0x2f6   :  { %v638_v41 = vadd.f32 %v630_v43, %v3107_v63  ;;  %v631_v59 = vrot.slane %v552_v53, 6  ;;  %v640_v56 = vadd.f32 %v632_v55, %v3109_v60  ;;  %v633_v61 = vrot.slane %v623_v51, 6 }
 0x2f8   :  { %v1677_v62 = vmul.f32 -1.442695, %v638_v41  ;;  %v639_v34 = vadd.f32 %v631_v59, %v3108_v47  ;;  %v1679_v49 = vmul.f32 -1.442695, %v640_v56  ;;  %v641_v0 = vadd.f32 %v633_v61, %v2333_v57 }
 0x2fa   :  { %1735 = vpow2.f32 %v1677_v62  ;;  %v1678_v1 = vmul.f32 -1.442695, %v639_v34 }
 0x2fc   :  { %1737 = vpow2.f32 %v1678_v1  ;;  %v662_v1 = vrot.slane %v2414_v54, 7 }
 0x2fd   :  { %1739 = vpow2.f32 %v1679_v49  ;;  %v3133_v49 = vld [vmem:[#allocation43_spill] sm:$0xff] }
 0x2fe   :  { %v1610_v61 = vsel %vm1609_vm0, %v3133_v49, %v2417_v52 }
 0x307   :  { %v1736_v9 = vpop.eup %1735 }
 0x308   :  { %v651_v45 = vadd.f32 1.0, %v1736_v9 }
 0x309   :  { %v1738_v50 = vpop.eup %1737 }
 0x30a   :  { %1741 = vrcp.f32 %v651_v45  ;;  %v652_v53 = vadd.f32 1.0, %v1738_v50  ;;  %v1740_v62 = vpop.eup %1739 }
 0x30b   :  { %1743 = vtanh.f32 %v641_v0  ;;  %v653_v43 = vadd.f32 1.0, %v1740_v62 }
 0x30c   :  { %1745 = vrcp.f32 %v652_v53 }
 0x30d   :  { %1747 = vrcp.f32 %v653_v43 }
 0x317   :  { %v1742_v59 = vpop.eup %1741 }
 0x318   :  { %v1744_v34 = vpop.eup %1743 }
 0x319   :  { %v1746_v58 = vpop.eup %1745  ;;  %v665_v51 = vmul.f32 %v1744_v34, %v1742_v59 }
 0x31a   :  { %v664_v55 = vmul.f32 %v1746_v58, %v662_v1  ;;  %v1748_v41 = vpop.eup %1747 }
 0x31c   :  { %v2491_v56 = vadd.f32 %v665_v51, %v664_v55 }
 0x31e   :  { %1749 = vtanh.f32 %v2491_v56  ;;  %v850_v34 = vrot.slane %v2491_v56, 7  ;;  %v2579_v56 = vld [vmem:[#allocation7 + $0x1e0] sm:$0xff] }
 0x32b   :  { %v1750_v45 = vpop.eup %1749 }
 0x32c   :  { %v668_v50 = vmul.f32 %v1750_v45, %v1748_v41 }
 0x32e   :  { %v670_v9 = vrot.slane %v668_v50, 2  ;;  %v2496_v0 = vsel %vm1611_vm1, %v1610_v61, %v668_v50 }
 0x330   :  { %737 = vmatmul.mubr.f32.vlgmr.msra.gmra.mxu0 %v670_v9  ;;  %808 = vmatmul.mubr.f32.vlgmr.msra.gmra.mxu1 %v670_v9  ;;  %v2582_v9 = vld [vmem:[#allocation7 + $0x1f0] sm:$0xff] }
 0x331   :  { %861 = vmatpush1.msra.mxu0 %v2060_v2  ;;  %932 = vmatpush1.msra.mxu1 %v2085_v11  ;;  %v3134_v2 = vld [vmem:[#allocation24_spill] sm:$0xff] }
 0x332   :  { %862 = vmatprep.subr.mxu0 %v2062_v3  ;;  %933 = vmatprep.subr.mxu1 %v2091_v13  ;;  %v3135_v3 = vld [vmem:[#allocation19_spill] sm:$0xff]  ;;  %v3142_v11 = vld [vmem:[#allocation32_spill] sm:$0xff]  ;;  %v3144_v13 = vld [vmem:[#allocation34_spill] sm:$0xff] }
 0x333   :  { %863 = vmatpush1.msra.mxu0 %v2065_v4  ;;  %934 = vmatpush1.msra.mxu1 %v2093_v14  ;;  %v3136_v4 = vld [vmem:[#allocation26_spill] sm:$0xff]  ;;  %v3145_v14 = vld [vmem:[#allocation25_spill] sm:$0xff] }
 0x334   :  { %864 = vmatprep.subr.mxu0 %v2068_v5  ;;  %935 = vmatprep.subr.mxu1 %v2099_v16  ;;  %v3137_v5 = vld [vmem:[#allocation20_spill] sm:$0xff]  ;;  %v3147_v16 = vld [vmem:[#allocation27_spill] sm:$0xff] }
 0x335   :  { %865 = vmatpush1.msra.mxu0 %v2071_v6  ;;  %936 = vmatpush1.msra.mxu1 %v2105_v18  ;;  %v3138_v6 = vld [vmem:[#allocation28_spill] sm:$0xff]  ;;  %v3149_v18 = vld [vmem:[#allocation29_spill] sm:$0xff] }
 0x336   :  { %866 = vmatprep.subr.mxu0 %v2074_v7  ;;  %937 = vmatprep.subr.mxu1 %v2107_v19  ;;  %v3139_v7 = vld [vmem:[#allocation21_spill] sm:$0xff] }
 0x337   :  { %867 = vmatpush1.msra.mxu0 %v2077_v8  ;;  %938 = vmatpush1.msra.mxu1 %v2113_v21  ;;  %v3140_v8 = vld [vmem:[#allocation30_spill] sm:$0xff]  ;;  %v3150_v19 = vld [vmem:[#allocation37_spill] sm:$0xff] }
 0x338   :  { %868 = vmatprep.subr.mxu0 %v2082_v10  ;;  %939 = vmatprep.subr.mxu1 %v2119_v23  ;;  %v3141_v10 = vld [vmem:[#allocation22_spill] sm:$0xff]  ;;  %v3154_v23 = vmov 0.0  }
 0x339   :  { %869 = vmatpush1.msra.mxu0 %v2088_v12  ;;  %940 = vmatpush1.msra.mxu1 %v2125_v25  ;;  %v3143_v12 = vld [vmem:[#allocation23_spill] sm:$0xff]  ;;  %v3152_v21 = vld [vmem:[#allocation38_spill] sm:$0xff]  ;;  %v2562_v25 = vld [vmem:[#allocation7 + $0x1e8] sm:$0xff] }
 0x33a   :  { %870 = vmatprep.subr.mxu0 %v2096_v15  ;;  %941 = vmatprep.subr.mxu1 %v2131_v27  ;;  %v3146_v15 = vld [vmem:[#allocation35_spill] sm:$0xff]  ;;  %3156 = vst [vmem:[#allocation40_spill] sm:$0xff] %v2562_v25 }
 0x33b   :  { %871 = vmatpush1.msra.mxu0 %v2102_v17  ;;  %942 = vmatpush1.msra.mxu1 %v2137_v29  ;;  %v3148_v17 = vld [vmem:[#allocation36_spill] sm:$0xff] }
 0x33c   :  { %872 = vmatprep.subr.mxu0 %v2110_v20  ;;  %943 = vmatprep.subr.mxu1 %v2143_v31  ;;  %v3151_v20 = vld [vmem:[#allocation31_spill] sm:$0xff] }
 0x33d   :  { %873 = vmatpush1.msra.mxu0 %v2116_v22  ;;  %944 = vmatpush1.msra.mxu1 %v2149_v33  ;;  %v3153_v22 = vld [vmem:[#allocation33_spill] sm:$0xff] }
 0x33e   :  { %874 = vmatprep.subr.mxu0 %v2122_v24  ;;  %945 = vmatprep.subr.mxu1 %v2158_v36  ;;  %v3155_v24 = vld [vmem:[#allocation39_spill] sm:$0xff] }
 0x33f   :  { %875 = vmatpush1.msra.mxu0 %v2128_v26  ;;  %946 = vmatpush1.msra.mxu1 %v2164_v38  ;;  %v2565_v26 = vld [vmem:[#allocation7 + $0x1f8] sm:$0xff] }
 0x340   :  { %876 = vmatprep.subr.mxu0 %v2134_v28  ;;  %947 = vmatprep.subr.mxu1 %v2170_v40  ;;  %3157 = vst [vmem:[#allocation41_spill] sm:$0xff] %v2565_v26 }
 0x341   :  { %877 = vmatpush1.msra.mxu0 %v2140_v30  ;;  %948 = vmatpush1.msra.mxu1 %v2176_v42 }
 0x342   :  { %878 = vmatprep.subr.mxu0 %v2146_v32  ;;  %949 = vmatprep.subr.mxu1 %v2182_v44 }
 0x343   :  { %879 = vmatpush1.msra.mxu0 %v2155_v35  ;;  %950 = vmatpush1.msra.mxu1 %v2188_v46 }
 0x344   :  { %880 = vmatprep.subr.mxu0 %v2161_v37  ;;  %951 = vmatprep.subr.mxu1 %v2194_v48 }
 0x345   :  { %881 = vmatpush1.msra.mxu0 %v2167_v39  ;;  %952 = vmatpush1.msra.mxu1 %v3134_v2  ;;  %v2585_v2 = vld [vmem:[#allocation7 + $0x1c8] sm:$0xff] }
 0x346   :  { %882 = vmatprep.subr.mxu0 %v3135_v3  ;;  %953 = vmatprep.subr.mxu1 %v3136_v4  ;;  %v2588_v3 = vld [vmem:[#allocation7 + $0x1d8] sm:$0xff]  ;;  %v2594_v4 = vld [vmem:[#allocation7 + $0x1d0] sm:$0xff] }
 0x347   :  { %883 = vmatpush1.msra.mxu0 %v3137_v5  ;;  %954 = vmatpush1.msra.mxu1 %v3138_v6  ;;  %v2597_v5 = vld [vmem:[#allocation7 + $0x1a8] sm:$0xff]  ;;  %v2600_v6 = vld [vmem:[#allocation7 + $0x1b8] sm:$0xff] }
 0x348   :  { %884 = vmatprep.subr.mxu0 %v3139_v7  ;;  %955 = vmatprep.subr.mxu1 %v3140_v8  ;;  %v2603_v7 = vld [vmem:[#allocation7 + $0x1a0] sm:$0xff]  ;;  %v2606_v8 = vld [vmem:[#allocation7 + $0x1b0] sm:$0xff] }
 0x349   :  { %885 = vmatpush1.msra.mxu0 %v3141_v10  ;;  %956 = vmatpush1.msra.mxu1 %v3142_v11  ;;  %v2609_v10 = vld [vmem:[#allocation7 + $0x188] sm:$0xff]  ;;  %v2612_v11 = vld [vmem:[#allocation7 + $0x198] sm:$0xff] }
 0x34a   :  { %886 = vmatprep.subr.mxu0 %v3143_v12  ;;  %957 = vmatprep.subr.mxu1 %v3144_v13  ;;  %v2615_v12 = vld [vmem:[#allocation7 + $0x180] sm:$0xff]  ;;  %v2618_v13 = vld [vmem:[#allocation7 + $0x190] sm:$0xff] }
 0x34b   :  { %887 = vmatpush1.msra.mxu0 %v3145_v14  ;;  %958 = vmatpush1.msra.mxu1 %v3146_v15  ;;  %v2621_v14 = vld [vmem:[#allocation7 + $0x168] sm:$0xff] }
 0x34c   :  { %888 = vmatprep.subr.mxu0 %v3147_v16  ;;  %959 = vmatprep.subr.mxu1 %v3148_v17  ;;  %v2624_v16 = vld [vmem:[#allocation7 + $0x178] sm:$0xff] }
 0x34d   :  { %889 = vmatpush1.msra.mxu0 %v3149_v18  ;;  %960 = vmatpush1.msra.mxu1 %v3150_v19  ;;  %v2627_v18 = vld [vmem:[#allocation7 + $0x160] sm:$0xff] }
 0x34e   :  { %890 = vmatprep.subr.mxu0 %v3151_v20  ;;  %961 = vmatprep.subr.mxu1 %v3152_v21  ;;  %v2630_v20 = vld [vmem:[#allocation7 + $0x170] sm:$0xff] }
 0x34f   :  { %891 = vmatpush1.msra.mxu0 %v3153_v22  ;;  %924 = vmatprep.mubr.f32.mxu0 %v3154_v23  ;;  %v2633_v22 = vld [vmem:[#allocation7 + $0x148] sm:$0xff] }
 0x350   :  { %962 = vmatpush1.msra.mxu1 %v3155_v24  ;;  %995 = vmatprep.mubr.f32.mxu1 %v3154_v23 }
 0x351   :  { %1048 = vmatprep.subr.mxu0 %v2562_v25  ;;  %1119 = vmatprep.subr.mxu1 %v2565_v26 }
 0x3f0   :  { %v738_v27 = vpop.f32.mrf.mxu0  ;;  %v809_v35 = vpop.f32.mrf.mxu1 }
 0x3f1   :  { %v818_v28 = vrot.slane %v738_v27, 5  ;;  %v820_v37 = vrot.slane %v809_v35, 5  ;;  %v2636_v27 = vld [vmem:[#allocation7 + $0x158] sm:$0xff]  ;;  %v2657_v35 = vld [vmem:[#allocation7 + $0x108] sm:$0xff] }
 0x3f2   :  { %v740_v29 = vpop.f32.mrf.mxu0  ;;  %v811_v38 = vpop.f32.mrf.mxu1 }
 0x3f3   :  { %v826_v30 = vadd.f32 %v818_v28, %v3107_v63  ;;  %v819_v31 = vrot.slane %v740_v29, 5  ;;  %v828_v39 = vadd.f32 %v820_v37, %v3109_v60  ;;  %v821_v40 = vrot.slane %v811_v38, 5  ;;  %v2639_v28 = vld [vmem:[#allocation7 + $0x140] sm:$0xff]  ;;  %v2642_v29 = vld [vmem:[#allocation7 + $0x150] sm:$0xff] }
 0x3f4   :  { %v2663_v37 = vld [vmem:[#allocation7 + $0x100] sm:$0xff]  ;;  %v2666_v38 = vld [vmem:[#allocation7 + $0x110] sm:$0xff] }
 0x3f5   :  { %v1680_v32 = vmul.f32 -1.442695, %v826_v30  ;;  %v827_v33 = vadd.f32 %v819_v31, %v3108_v47  ;;  %v1682_v42 = vmul.f32 -1.442695, %v828_v39  ;;  %v829_v46 = vadd.f32 %v821_v40, %v2333_v57  ;;  %v2645_v30 = vld [vmem:[#allocation7 + $0x128] sm:$0xff]  ;;  %v2648_v31 = vld [vmem:[#allocation7 + $0x138] sm:$0xff] }
 0x3f6   :  { %v2669_v39 = vld [vmem:[#allocation7 + $0xe8] sm:$0xff]  ;;  %v2672_v40 = vld [vmem:[#allocation7 + $0xf8] sm:$0xff] }
 0x3f7   :  { %1751 = vpow2.f32 %v1680_v32  ;;  %v1681_v36 = vmul.f32 -1.442695, %v827_v33  ;;  %v2651_v32 = vld [vmem:[#allocation7 + $0x120] sm:$0xff]  ;;  %v2654_v33 = vld [vmem:[#allocation7 + $0x130] sm:$0xff] }
 0x3f9   :  { %1753 = vpow2.f32 %v1681_v36  ;;  %v2660_v36 = vld [vmem:[#allocation7 + $0x118] sm:$0xff] }
 0x3fa   :  { %1755 = vpow2.f32 %v1682_v42  ;;  %v2675_v42 = vld [vmem:[#allocation7 + $0xe0] sm:$0xff] }
 0x404   :  { %v1752_v44 = vpop.eup %1751 }
 0x405   :  { %v839_v48 = vadd.f32 1.0, %v1752_v44  ;;  %v2678_v44 = vld [vmem:[#allocation7 + $0xf0] sm:$0xff] }
 0x406   :  { %v1754_v54 = vpop.eup %1753 }
 0x407   :  { %1757 = vrcp.f32 %v839_v48  ;;  %v840_v52 = vadd.f32 1.0, %v1754_v54  ;;  %v1756_v53 = vpop.eup %1755  ;;  %v2684_v48 = vld [vmem:[#allocation7 + $0xd8] sm:$0xff]  ;;  %v2687_v54 = vld [vmem:[#allocation7 + $0xc0] sm:$0xff] }
 0x408   :  { %1759 = vtanh.f32 %v829_v46  ;;  %v841_v58 = vadd.f32 1.0, %v1756_v53  ;;  %v2681_v46 = vld [vmem:[#allocation7 + $0xc8] sm:$0xff] }
 0x409   :  { %1761 = vrcp.f32 %v840_v52  ;;  %v2690_v52 = vld [vmem:[#allocation7 + $0xd0] sm:$0xff]  ;;  %v2693_v53 = vld [vmem:[#allocation7 + $0xa8] sm:$0xff] }
 0x40a   :  { %1763 = vrcp.f32 %v841_v58  ;;  %v2708_v58 = vld [vmem:[#allocation7 + $0x98] sm:$0xff] }
 0x40b   :  { %3160 = vst [vmem:[#allocation18_spill] sm:$0xff] %v2708_v58 }
 0x414   :  { %v1758_v62 = vpop.eup %1757 }
 0x415   :  { %v1760_v59 = vpop.eup %1759 }
 0x416   :  { %v1762_v1 = vpop.eup %1761  ;;  %v853_v55 = vmul.f32 %v1760_v59, %v1758_v62  ;;  %v2696_v62 = vld [vmem:[#allocation7 + $0xb8] sm:$0xff]  ;;  %v2699_v59 = vld [vmem:[#allocation7 + $0xa0] sm:$0xff] }
 0x417   :  { %v852_v43 = vmul.f32 %v1762_v1, %v850_v34  ;;  %v1764_v41 = vpop.eup %1763  ;;  %v2702_v34 = vld [vmem:[#allocation7 + $0xb0] sm:$0xff]  ;;  %v2705_v1 = vld [vmem:[#allocation7 + $0x88] sm:$0xff] }
 0x418   :  { %3158 = vst [vmem:[#allocation42_spill] sm:$0xff] %v2702_v34  ;;  %3159 = vst [vmem:[#allocation17_spill] sm:$0xff] %v2705_v1 }
 0x419   :  { %v2573_v51 = vadd.f32 %v853_v55, %v852_v43  ;;  %v2711_v43 = vld [vmem:[#allocation7 + $0x80] sm:$0xff]  ;;  %v2714_v55 = vld [vmem:[#allocation7 + $0x90] sm:$0xff] }
 0x41a   :  { %3161 = vst [vmem:[#allocation43_spill] sm:$0xff] %v2711_v43  ;;  %3162 = vst [vmem:[#allocation24_spill] sm:$0xff] %v2714_v55 }
 0x41b   :  { %1765 = vtanh.f32 %v2573_v51 }
 0x428   :  { %v1766_v45 = vpop.eup %1765 }
 0x429   :  { %v856_v50 = vmul.f32 %v1766_v45, %v1764_v41  ;;  %v2717_v41 = vld [vmem:[#allocation7 + $0x68] sm:$0xff]  ;;  %v2720_v45 = vld [vmem:[#allocation7 + $0x78] sm:$0xff] }
 0x42a   :  { %3163 = vst [vmem:[#allocation19_spill] sm:$0xff] %v2717_v41  ;;  %3164 = vst [vmem:[#allocation26_spill] sm:$0xff] %v2720_v45 }
 0x42b   :  { %v858_v49 = vrot.slane %v856_v50, 3  ;;  %v2577_v61 = vsel %vm1613_vm2, %v2496_v0, %v856_v50  ;;  %v2591_v0 = vld [vmem:[#allocation7 + $0x1c0] sm:$0xff] }
 0x42c   :  { %v2723_v50 = vld [vmem:[#allocation7 + $0x60] sm:$0xff] }
 0x42d   :  { %925 = vmatmul.mubr.f32.vlgmr.msra.gmra.mxu0 %v858_v49  ;;  %996 = vmatmul.mubr.f32.vlgmr.msra.gmra.mxu1 %v858_v49  ;;  %3165 = vst [vmem:[#allocation20_spill] sm:$0xff] %v2723_v50  ;;  %v2726_v49 = vld [vmem:[#allocation7 + $0x70] sm:$0xff] }
 0x42e   :  { %1049 = vmatpush1.msra.mxu0 %v2579_v56  ;;  %1120 = vmatpush1.msra.mxu1 %v2582_v9  ;;  %3166 = vst [vmem:[#allocation28_spill] sm:$0xff] %v2726_v49 }
 0x42f   :  { %1050 = vmatprep.subr.mxu0 %v2585_v2  ;;  %1121 = vmatprep.subr.mxu1 %v2588_v3 }
 0x430   :  { %1051 = vmatpush1.msra.mxu0 %v2591_v0  ;;  %1122 = vmatpush1.msra.mxu1 %v2594_v4 }
 0x431   :  { %1052 = vmatprep.subr.mxu0 %v2597_v5  ;;  %1123 = vmatprep.subr.mxu1 %v2600_v6 }
 0x432   :  { %1053 = vmatpush1.msra.mxu0 %v2603_v7  ;;  %1124 = vmatpush1.msra.mxu1 %v2606_v8 }
 0x433   :  { %1054 = vmatprep.subr.mxu0 %v2609_v10  ;;  %1125 = vmatprep.subr.mxu1 %v2612_v11 }
 0x434   :  { %1055 = vmatpush1.msra.mxu0 %v2615_v12  ;;  %1126 = vmatpush1.msra.mxu1 %v2618_v13 }
 0x435   :  { %1056 = vmatprep.subr.mxu0 %v2621_v14  ;;  %1127 = vmatprep.subr.mxu1 %v2624_v16 }
 0x436   :  { %1057 = vmatpush1.msra.mxu0 %v2627_v18  ;;  %1128 = vmatpush1.msra.mxu1 %v2630_v20 }
 0x437   :  { %1058 = vmatprep.subr.mxu0 %v2633_v22  ;;  %1129 = vmatprep.subr.mxu1 %v2636_v27 }
 0x438   :  { %1059 = vmatpush1.msra.mxu0 %v2639_v28  ;;  %1130 = vmatpush1.msra.mxu1 %v2642_v29 }
 0x439   :  { %1060 = vmatprep.subr.mxu0 %v2645_v30  ;;  %1131 = vmatprep.subr.mxu1 %v2648_v31 }
 0x43a   :  { %1061 = vmatpush1.msra.mxu0 %v2651_v32  ;;  %1132 = vmatpush1.msra.mxu1 %v2654_v33 }
 0x43b   :  { %1062 = vmatprep.subr.mxu0 %v2657_v35  ;;  %1133 = vmatprep.subr.mxu1 %v2660_v36 }
 0x43c   :  { %1063 = vmatpush1.msra.mxu0 %v2663_v37  ;;  %1134 = vmatpush1.msra.mxu1 %v2666_v38 }
 0x43d   :  { %1064 = vmatprep.subr.mxu0 %v2669_v39  ;;  %1135 = vmatprep.subr.mxu1 %v2672_v40 }
 0x43e   :  { %1065 = vmatpush1.msra.mxu0 %v2675_v42  ;;  %1136 = vmatpush1.msra.mxu1 %v2678_v44 }
 0x43f   :  { %1066 = vmatprep.subr.mxu0 %v2681_v46  ;;  %1137 = vmatprep.subr.mxu1 %v2684_v48 }
 0x440   :  { %1067 = vmatpush1.msra.mxu0 %v2687_v54  ;;  %1138 = vmatpush1.msra.mxu1 %v2690_v52 }
 0x441   :  { %1068 = vmatprep.subr.mxu0 %v2693_v53  ;;  %1139 = vmatprep.subr.mxu1 %v2696_v62 }
 0x442   :  { %1069 = vmatpush1.msra.mxu0 %v2699_v59  ;;  %1140 = vmatpush1.msra.mxu1 %v2702_v34 }
 0x443   :  { %1070 = vmatprep.subr.mxu0 %v2705_v1  ;;  %1141 = vmatprep.subr.mxu1 %v2708_v58 }
 0x444   :  { %1071 = vmatpush1.msra.mxu0 %v2711_v43  ;;  %1142 = vmatpush1.msra.mxu1 %v2714_v55  ;;  %v2729_v43 = vld [vmem:[#allocation7 + $0x48] sm:$0xff]  ;;  %v2732_v55 = vld [vmem:[#allocation7 + $0x58] sm:$0xff] }
 0x445   :  { %1072 = vmatprep.subr.mxu0 %v2717_v41  ;;  %1143 = vmatprep.subr.mxu1 %v2720_v45  ;;  %3167 = vst [vmem:[#allocation21_spill] sm:$0xff] %v2729_v43  ;;  %3168 = vst [vmem:[#allocation30_spill] sm:$0xff] %v2732_v55  ;;  %v2735_v41 = vld [vmem:[#allocation7 + $0x40] sm:$0xff]  ;;  %v2739_v45 = vld [vmem:[#allocation7 + $0x28] sm:$0xff] }
 0x446   :  { %1073 = vmatpush1.msra.mxu0 %v2723_v50  ;;  %1144 = vmatpush1.msra.mxu1 %v2726_v49  ;;  %3169 = vst [vmem:[#allocation22_spill] sm:$0xff] %v2735_v41  ;;  %3170 = vst [vmem:[#allocation32_spill] sm:$0xff] %v2739_v45  ;;  %v2743_v49 = vld [vmem:[#allocation7 + $0x20] sm:$0xff] }
 0x447   :  { %1074 = vmatprep.subr.mxu0 %v2729_v43  ;;  %1145 = vmatprep.subr.mxu1 %v2732_v55  ;;  %3171 = vst [vmem:[#allocation23_spill] sm:$0xff] %v2743_v49  ;;  %v2747_v43 = vld [vmem:[#allocation7 + $0x8] sm:$0xff] }
 0x448   :  { %1075 = vmatpush1.msra.mxu0 %v2735_v41  ;;  %1146 = vmatpush1.msra.mxu1 %v3146_v15  ;;  %3172 = vst [vmem:[#allocation34_spill] sm:$0xff] %v2747_v43  ;;  %v2751_v41 = vld [vmem:[#allocation7] sm:$0xff] }
 0x449   :  { %1076 = vmatprep.subr.mxu0 %v2739_v45  ;;  %1147 = vmatprep.subr.mxu1 %v3148_v17  ;;  %3173 = vst [vmem:[#allocation25_spill] sm:$0xff] %v2751_v41 }
 0x44a   :  { %1077 = vmatpush1.msra.mxu0 %v2743_v49  ;;  %1148 = vmatpush1.msra.mxu1 %v3150_v19 }
 0x44b   :  { %1078 = vmatprep.subr.mxu0 %v2747_v43  ;;  %1149 = vmatprep.subr.mxu1 %v3152_v21 }
 0x44c   :  { %1079 = vmatpush1.msra.mxu0 %v2751_v41  ;;  %1112 = vmatprep.mubr.f32.mxu0 %v3154_v23 }
 0x44d   :  { %1150 = vmatpush1.msra.mxu1 %v3155_v24  ;;  %1183 = vmatprep.mubr.f32.mxu1 %v3154_v23 }
 0x44e   :  { %1236 = vmatprep.subr.mxu0 %v2562_v25  ;;  %1307 = vmatprep.subr.mxu1 %v2565_v26 }
 0x4ed   :  { %v926_v15 = vpop.f32.mrf.mxu0  ;;  %v997_v41 = vpop.f32.mrf.mxu1 }
 0x4ee   :  { %v1006_v17 = vrot.slane %v926_v15, 4  ;;  %v1008_v24 = vrot.slane %v997_v41, 4 }
 0x4ef   :  { %v928_v19 = vpop.f32.mrf.mxu0  ;;  %v999_v50 = vpop.f32.mrf.mxu1 }
 0x4f0   :  { %v1014_v43 = vadd.f32 %v1006_v17, %v3107_v63  ;;  %v1007_v21 = vrot.slane %v928_v19, 4  ;;  %v1016_v23 = vadd.f32 %v1008_v24, %v3109_v60  ;;  %v1009_v25 = vrot.slane %v999_v50, 4  ;;  %v3177_v17 = vld [vmem:[#allocation43_spill] sm:$0xff]  ;;  %v3178_v19 = vld [vmem:[#allocation24_spill] sm:$0xff]  ;;  %v3180_v24 = vld [vmem:[#allocation26_spill] sm:$0xff] }
 0x4f2   :  { %v1683_v49 = vmul.f32 -1.442695, %v1014_v43  ;;  %v1015_v45 = vadd.f32 %v1007_v21, %v3108_v47  ;;  %v1685_v58 = vmul.f32 -1.442695, %v1016_v23  ;;  %v1017_v15 = vadd.f32 %v1009_v25, %v2333_v57  ;;  %v3179_v21 = vld [vmem:[#allocation19_spill] sm:$0xff] }
 0x4f4   :  { %1767 = vpow2.f32 %v1683_v49  ;;  %v1684_v55 = vmul.f32 -1.442695, %v1015_v45 }
 0x4f6   :  { %1769 = vpow2.f32 %v1684_v55  ;;  %v1038_v55 = vrot.slane %v2573_v51, 7  ;;  %v3174_v51 = vld [vmem:[#allocation42_spill] sm:$0xff] }
 0x4f7   :  { %1771 = vpow2.f32 %v1685_v58  ;;  %v3176_v58 = vld [vmem:[#allocation18_spill] sm:$0xff] }
 0x501   :  { %v1768_v26 = vpop.eup %1767 }
 0x502   :  { %v1027_v1 = vadd.f32 1.0, %v1768_v26 }
 0x503   :  { %v1770_v34 = vpop.eup %1769 }
 0x504   :  { %1773 = vrcp.f32 %v1027_v1  ;;  %v1028_v63 = vadd.f32 1.0, %v1770_v34  ;;  %v1772_v47 = vpop.eup %1771 }
 0x505   :  { %1775 = vtanh.f32 %v1017_v15  ;;  %v1029_v49 = vadd.f32 1.0, %v1772_v47  ;;  %v3181_v15 = vld [vmem:[#allocation20_spill] sm:$0xff]  ;;  %v3183_v47 = vld [vmem:[#allocation21_spill] sm:$0xff] }
 0x506   :  { %1777 = vrcp.f32 %v1028_v63  ;;  %v3182_v63 = vld [vmem:[#allocation28_spill] sm:$0xff] }
 0x507   :  { %1779 = vrcp.f32 %v1029_v49  ;;  %v2827_v49 = vld [vmem:[#allocation7 + $0x38] sm:$0xff] }
 0x508   :  { %3188 = vst [vmem:[#allocation27_spill] sm:$0xff] %v2827_v49 }
 0x511   :  { %v1774_v43 = vpop.eup %1773 }
 0x512   :  { %v1776_v45 = vpop.eup %1775 }
 0x513   :  { %v1778_v41 = vpop.eup %1777  ;;  %v1041_v50 = vmul.f32 %v1776_v45, %v1774_v43  ;;  %v3184_v43 = vld [vmem:[#allocation30_spill] sm:$0xff] }
 0x514   :  { %v1040_v60 = vmul.f32 %v1778_v41, %v1038_v55  ;;  %v1780_v57 = vpop.eup %1779  ;;  %v3185_v45 = vld [vmem:[#allocation22_spill] sm:$0xff]  ;;  %v3187_v41 = vld [vmem:[#allocation32_spill] sm:$0xff] }
 0x515   :  { %v2823_v55 = vld [vmem:[#allocation7 + $0x50] sm:$0xff] }
 0x516   :  { %v2764_v23 = vadd.f32 %v1041_v50, %v1040_v60  ;;  %3186 = vst [vmem:[#allocation35_spill] sm:$0xff] %v2823_v55  ;;  %v3189_v60 = vld [vmem:[#allocation23_spill] sm:$0xff]  ;;  %v2831_v50 = vld [vmem:[#allocation7 + $0x30] sm:$0xff] }
 0x517   :  { %3190 = vst [vmem:[#allocation36_spill] sm:$0xff] %v2831_v50 }
 0x518   :  { %1781 = vtanh.f32 %v2764_v23 }
 0x525   :  { %v1782_v25 = vpop.eup %1781 }
 0x526   :  { %v1044_v26 = vmul.f32 %v1782_v25, %v1780_v57  ;;  %v3191_v57 = vld [vmem:[#allocation34_spill] sm:$0xff] }
 0x527   :  { %v2835_v25 = vld [vmem:[#allocation7 + $0x18] sm:$0xff] }
 0x528   :  { %v1046_v34 = vrot.slane %v1044_v26, 4  ;;  %v2768_v1 = vsel %vm1615_vm3, %v2577_v61, %v1044_v26  ;;  %v3175_v61 = vld [vmem:[#allocation17_spill] sm:$0xff]  ;;  %3192 = vst [vmem:[#allocation29_spill] sm:$0xff] %v2835_v25 }
 0x529   :  { %v3193_v26 = vld [vmem:[#allocation25_spill] sm:$0xff] }
 0x52a   :  { %1113 = vmatmul.mubr.f32.vlgmr.msra.gmra.mxu0 %v1046_v34  ;;  %1184 = vmatmul.mubr.f32.vlgmr.msra.gmra.mxu1 %v1046_v34  ;;  %v3194_v34 = vmov 0.0  }
 0x52b   :  { %1237 = vmatpush1.msra.mxu0 %v2579_v56  ;;  %1308 = vmatpush1.msra.mxu1 %v2582_v9 }
 0x52c   :  { %1238 = vmatprep.subr.mxu0 %v2585_v2  ;;  %1309 = vmatprep.subr.mxu1 %v2588_v3 }
 0x52d   :  { %1239 = vmatpush1.msra.mxu0 %v2591_v0  ;;  %1310 = vmatpush1.msra.mxu1 %v2594_v4 }
 0x52e   :  { %1240 = vmatprep.subr.mxu0 %v2597_v5  ;;  %1311 = vmatprep.subr.mxu1 %v2600_v6 }
 0x52f   :  { %1241 = vmatpush1.msra.mxu0 %v2603_v7  ;;  %1312 = vmatpush1.msra.mxu1 %v2606_v8 }
 0x530   :  { %1242 = vmatprep.subr.mxu0 %v2609_v10  ;;  %1313 = vmatprep.subr.mxu1 %v2612_v11 }
 0x531   :  { %1243 = vmatpush1.msra.mxu0 %v2615_v12  ;;  %1314 = vmatpush1.msra.mxu1 %v2618_v13 }
 0x532   :  { %1244 = vmatprep.subr.mxu0 %v2621_v14  ;;  %1315 = vmatprep.subr.mxu1 %v2624_v16 }
 0x533   :  { %1245 = vmatpush1.msra.mxu0 %v2627_v18  ;;  %1316 = vmatpush1.msra.mxu1 %v2630_v20 }
 0x534   :  { %1246 = vmatprep.subr.mxu0 %v2633_v22  ;;  %1317 = vmatprep.subr.mxu1 %v2636_v27 }
 0x535   :  { %1247 = vmatpush1.msra.mxu0 %v2639_v28  ;;  %1318 = vmatpush1.msra.mxu1 %v2642_v29 }
 0x536   :  { %1248 = vmatprep.subr.mxu0 %v2645_v30  ;;  %1319 = vmatprep.subr.mxu1 %v2648_v31 }
 0x537   :  { %1249 = vmatpush1.msra.mxu0 %v2651_v32  ;;  %1320 = vmatpush1.msra.mxu1 %v2654_v33 }
 0x538   :  { %1250 = vmatprep.subr.mxu0 %v2657_v35  ;;  %1321 = vmatprep.subr.mxu1 %v2660_v36 }
 0x539   :  { %1251 = vmatpush1.msra.mxu0 %v2663_v37  ;;  %1322 = vmatpush1.msra.mxu1 %v2666_v38 }
 0x53a   :  { %1252 = vmatprep.subr.mxu0 %v2669_v39  ;;  %1323 = vmatprep.subr.mxu1 %v2672_v40 }
 0x53b   :  { %1253 = vmatpush1.msra.mxu0 %v2675_v42  ;;  %1324 = vmatpush1.msra.mxu1 %v2678_v44 }
 0x53c   :  { %1254 = vmatprep.subr.mxu0 %v2681_v46  ;;  %1325 = vmatprep.subr.mxu1 %v2684_v48 }
 0x53d   :  { %1255 = vmatpush1.msra.mxu0 %v2687_v54  ;;  %1326 = vmatpush1.msra.mxu1 %v2690_v52 }
 0x53e   :  { %1256 = vmatprep.subr.mxu0 %v2693_v53  ;;  %1327 = vmatprep.subr.mxu1 %v2696_v62 }
 0x53f   :  { %1257 = vmatpush1.msra.mxu0 %v2699_v59  ;;  %1328 = vmatpush1.msra.mxu1 %v3174_v51 }
 0x540   :  { %1258 = vmatprep.subr.mxu0 %v3175_v61  ;;  %1329 = vmatprep.subr.mxu1 %v3176_v58 }
 0x541   :  { %1259 = vmatpush1.msra.mxu0 %v3177_v17  ;;  %1330 = vmatpush1.msra.mxu1 %v3178_v19 }
 0x542   :  { %1260 = vmatprep.subr.mxu0 %v3179_v21  ;;  %1331 = vmatprep.subr.mxu1 %v3180_v24 }
 0x543   :  { %1261 = vmatpush1.msra.mxu0 %v3181_v15  ;;  %1332 = vmatpush1.msra.mxu1 %v3182_v63 }
 0x544   :  { %1262 = vmatprep.subr.mxu0 %v3183_v47  ;;  %1333 = vmatprep.subr.mxu1 %v3184_v43  ;;  %v2849_v47 = vld [vmem:[#allocation4 + $0x8] sm:$0xff] }
 0x545   :  { %1263 = vmatpush1.msra.mxu0 %v3185_v45  ;;  %1334 = vmatpush1.msra.mxu1 %v2823_v55  ;;  %v2846_v45 = vld [vmem:[#allocation4] sm:$0xff]  ;;  %3199 = vst [vmem:[#allocation38_spill] sm:$0xff] %v2849_v47 }
 0x546   :  { %1264 = vmatprep.subr.mxu0 %v3187_v41  ;;  %1335 = vmatprep.subr.mxu1 %v2827_v49  ;;  %v2840_v41 = vld [vmem:[#allocation7 + $0x10] sm:$0xff]  ;;  %3198 = vst [vmem:[#allocation31_spill] sm:$0xff] %v2846_v45 }
 0x547   :  { %1265 = vmatpush1.msra.mxu0 %v3189_v60  ;;  %1336 = vmatpush1.msra.mxu1 %v2831_v50  ;;  %3195 = vst [vmem:[#allocation37_spill] sm:$0xff] %v2840_v41  ;;  %v3196_v60 = vld [vmem:[#allocation40_spill] sm:$0xff]  ;;  %v3197_v49 = vld [vmem:[#allocation41_spill] sm:$0xff] }
 0x548   :  { %1266 = vmatprep.subr.mxu0 %v3191_v57  ;;  %1337 = vmatprep.subr.mxu1 %v2835_v25 }
 0x549   :  { %1267 = vmatpush1.msra.mxu0 %v3193_v26  ;;  %1300 = vmatprep.mubr.f32.mxu0 %v3194_v34 }
 0x54a   :  { %1338 = vmatpush1.msra.mxu1 %v2840_v41  ;;  %1371 = vmatprep.mubr.f32.mxu1 %v3194_v34 }
 0x54b   :  { %1424 = vmatprep.subr.mxu0 %v3196_v60  ;;  %1495 = vmatprep.subr.mxu1 %v3197_v49  ;;  %v2852_v49 = vld [vmem:[#allocation4 + $0x10] sm:$0xff] }
 0x54c   :  { %3200 = vst [vmem:[#allocation33_spill] sm:$0xff] %v2852_v49 }
 0x5ea   :  { %v1114_v50 = vpop.f32.mrf.mxu0  ;;  %v1185_v41 = vpop.f32.mrf.mxu1 }
 0x5eb   :  { %v1194_v57 = vrot.slane %v1114_v50, 3  ;;  %v1196_v60 = vrot.slane %v1185_v41, 3 }
 0x5ec   :  { %v1116_v55 = vpop.f32.mrf.mxu0  ;;  %v1187_v15 = vpop.f32.mrf.mxu1 }
 0x5ed   :  { %v1202_v25 = vadd.f32 %v2846_v45, %v1194_v57  ;;  %v1195_v26 = vrot.slane %v1116_v55, 3  ;;  %v1204_v50 = vadd.f32 %v2852_v49, %v1196_v60  ;;  %v1197_v24 = vrot.slane %v1187_v15, 3  ;;  %v2855_v57 = vld [vmem:[#allocation4 + $0x18] sm:$0xff] }
 0x5ef   :  { %v1686_v43 = vmul.f32 -1.442695, %v1202_v25  ;;  %v1203_v63 = vadd.f32 %v2849_v47, %v1195_v26  ;;  %v1688_v21 = vmul.f32 -1.442695, %v1204_v50  ;;  %v1205_v55 = vadd.f32 %v2855_v57, %v1197_v24 }
 0x5f1   :  { %1783 = vpow2.f32 %v1686_v43  ;;  %v1687_v34 = vmul.f32 -1.442695, %v1203_v63 }
 0x5f3   :  { %1785 = vpow2.f32 %v1687_v34  ;;  %v1226_v34 = vrot.slane %v2764_v23, 7 }
 0x5f4   :  { %1787 = vpow2.f32 %v1688_v21 }
 0x5fe   :  { %v1784_v19 = vpop.eup %1783 }
 0x5ff   :  { %v1215_v25 = vadd.f32 1.0, %v1784_v19 }
 0x600   :  { %v1786_v45 = vpop.eup %1785 }
 0x601   :  { %1789 = vrcp.f32 %v1215_v25  ;;  %v1216_v43 = vadd.f32 1.0, %v1786_v45  ;;  %v1788_v63 = vpop.eup %1787 }
 0x602   :  { %1791 = vtanh.f32 %v1205_v55  ;;  %v1217_v15 = vadd.f32 1.0, %v1788_v63 }
 0x603   :  { %1793 = vrcp.f32 %v1216_v43 }
 0x604   :  { %1795 = vrcp.f32 %v1217_v15 }
 0x60e   :  { %v1790_v41 = vpop.eup %1789 }
 0x60f   :  { %v1792_v26 = vpop.eup %1791 }
 0x610   :  { %v1794_v60 = vpop.eup %1793  ;;  %v1229_v49 = vmul.f32 %v1792_v26, %v1790_v41 }
 0x611   :  { %v1228_v50 = vmul.f32 %v1794_v60, %v1226_v34  ;;  %v1796_v19 = vpop.eup %1795 }
 0x613   :  { %v2859_v47 = vadd.f32 %v1229_v49, %v1228_v50 }
 0x615   :  { %1797 = vtanh.f32 %v2859_v47 }
 0x622   :  { %v1798_v21 = vpop.eup %1797 }
 0x623   :  { %v1232_v24 = vmul.f32 %v1798_v21, %v1796_v19 }
 0x625   :  { %v1234_v45 = vrot.slane %v1232_v24, 5  ;;  %v2863_v55 = vsel %vm1617_vm4, %v2768_v1, %v1232_v24 }
 0x627   :  { %1301 = vmatmul.mubr.f32.vlgmr.msra.gmra.mxu0 %v1234_v45  ;;  %1372 = vmatmul.mubr.f32.vlgmr.msra.gmra.mxu1 %v1234_v45 }
 0x628   :  { %1425 = vmatpush1.msra.mxu0 %v2579_v56  ;;  %1496 = vmatpush1.msra.mxu1 %v2582_v9  ;;  %v3201_v56 = vld [vmem:[#allocation24_spill] sm:$0xff]  ;;  %v3202_v9 = vld [vmem:[#allocation19_spill] sm:$0xff] }
 0x629   :  { %1426 = vmatprep.subr.mxu0 %v2585_v2  ;;  %1497 = vmatprep.subr.mxu1 %v2588_v3  ;;  %v3203_v2 = vld [vmem:[#allocation26_spill] sm:$0xff]  ;;  %v3204_v3 = vld [vmem:[#allocation20_spill] sm:$0xff] }
 0x62a   :  { %1427 = vmatpush1.msra.mxu0 %v2591_v0  ;;  %1498 = vmatpush1.msra.mxu1 %v2594_v4  ;;  %v3205_v0 = vld [vmem:[#allocation28_spill] sm:$0xff]  ;;  %v3206_v4 = vld [vmem:[#allocation21_spill] sm:$0xff] }
 0x62b   :  { %1428 = vmatprep.subr.mxu0 %v2597_v5  ;;  %1499 = vmatprep.subr.mxu1 %v2600_v6  ;;  %v3207_v5 = vld [vmem:[#allocation30_spill] sm:$0xff] }
 0x62c   :  { %1429 = vmatpush1.msra.mxu0 %v2603_v7  ;;  %1500 = vmatpush1.msra.mxu1 %v2606_v8  ;;  %v3208_v6 = vld [vmem:[#allocation22_spill] sm:$0xff]  ;;  %v3209_v7 = vld [vmem:[#allocation35_spill] sm:$0xff]  ;;  %v3210_v8 = vld [vmem:[#allocation32_spill] sm:$0xff] }
 0x62d   :  { %1430 = vmatprep.subr.mxu0 %v2609_v10  ;;  %1501 = vmatprep.subr.mxu1 %v2612_v11  ;;  %v3211_v10 = vld [vmem:[#allocation27_spill] sm:$0xff] }
 0x62e   :  { %1431 = vmatpush1.msra.mxu0 %v2615_v12  ;;  %1502 = vmatpush1.msra.mxu1 %v2618_v13  ;;  %v3212_v11 = vld [vmem:[#allocation23_spill] sm:$0xff]  ;;  %v3213_v12 = vld [vmem:[#allocation36_spill] sm:$0xff]  ;;  %v3214_v13 = vld [vmem:[#allocation34_spill] sm:$0xff] }
 0x62f   :  { %1432 = vmatprep.subr.mxu0 %v2621_v14  ;;  %1503 = vmatprep.subr.mxu1 %v2624_v16  ;;  %v3215_v14 = vld [vmem:[#allocation29_spill] sm:$0xff] }
 0x630   :  { %1433 = vmatpush1.msra.mxu0 %v2627_v18  ;;  %1504 = vmatpush1.msra.mxu1 %v2630_v20  ;;  %v3216_v16 = vld [vmem:[#allocation25_spill] sm:$0xff]  ;;  %v3217_v18 = vmov 0.0  }
 0x631   :  { %1434 = vmatprep.subr.mxu0 %v2633_v22  ;;  %1505 = vmatprep.subr.mxu1 %v2636_v27  ;;  %v3218_v20 = vld [vmem:[#allocation37_spill] sm:$0xff] }
 0x632   :  { %1435 = vmatpush1.msra.mxu0 %v2639_v28  ;;  %1506 = vmatpush1.msra.mxu1 %v2642_v29  ;;  %v3219_v29 = vld [vmem:[#allocation31_spill] sm:$0xff] }
 0x633   :  { %1436 = vmatprep.subr.mxu0 %v2645_v30  ;;  %1507 = vmatprep.subr.mxu1 %v2648_v31 }
 0x634   :  { %1437 = vmatpush1.msra.mxu0 %v2651_v32  ;;  %1508 = vmatpush1.msra.mxu1 %v2654_v33  ;;  %v3220_v33 = vld [vmem:[#allocation38_spill] sm:$0xff] }
 0x635   :  { %1438 = vmatprep.subr.mxu0 %v2657_v35  ;;  %1509 = vmatprep.subr.mxu1 %v2660_v36 }
 0x636   :  { %1439 = vmatpush1.msra.mxu0 %v2663_v37  ;;  %1510 = vmatpush1.msra.mxu1 %v2666_v38 }
 0x637   :  { %1440 = vmatprep.subr.mxu0 %v2669_v39  ;;  %1511 = vmatprep.subr.mxu1 %v2672_v40  ;;  %v3221_v40 = vld [vmem:[#allocation33_spill] sm:$0xff] }
 0x638   :  { %1441 = vmatpush1.msra.mxu0 %v2675_v42  ;;  %1512 = vmatpush1.msra.mxu1 %v2678_v44 }
 0x639   :  { %1442 = vmatprep.subr.mxu0 %v2681_v46  ;;  %1513 = vmatprep.subr.mxu1 %v2684_v48 }
 0x63a   :  { %1443 = vmatpush1.msra.mxu0 %v2687_v54  ;;  %1514 = vmatpush1.msra.mxu1 %v2690_v52 }
 0x63b   :  { %1444 = vmatprep.subr.mxu0 %v2693_v53  ;;  %1515 = vmatprep.subr.mxu1 %v2696_v62 }
 0x63c   :  { %1445 = vmatpush1.msra.mxu0 %v2699_v59  ;;  %1516 = vmatpush1.msra.mxu1 %v3174_v51  ;;  %v1414_v51 = vrot.slane %v2859_v47, 7 }
 0x63d   :  { %1446 = vmatprep.subr.mxu0 %v3175_v61  ;;  %1517 = vmatprep.subr.mxu1 %v3176_v58 }
 0x63e   :  { %1447 = vmatpush1.msra.mxu0 %v3177_v17  ;;  %1518 = vmatpush1.msra.mxu1 %v3201_v56 }
 0x63f   :  { %1448 = vmatprep.subr.mxu0 %v3202_v9  ;;  %1519 = vmatprep.subr.mxu1 %v3203_v2 }
 0x640   :  { %1449 = vmatpush1.msra.mxu0 %v3204_v3  ;;  %1520 = vmatpush1.msra.mxu1 %v3205_v0 }
 0x641   :  { %1450 = vmatprep.subr.mxu0 %v3206_v4  ;;  %1521 = vmatprep.subr.mxu1 %v3207_v5 }
 0x642   :  { %1451 = vmatpush1.msra.mxu0 %v3208_v6  ;;  %1522 = vmatpush1.msra.mxu1 %v3209_v7 }
 0x643   :  { %1452 = vmatprep.subr.mxu0 %v3210_v8  ;;  %1523 = vmatprep.subr.mxu1 %v3211_v10 }
 0x644   :  { %1453 = vmatpush1.msra.mxu0 %v3212_v11  ;;  %1524 = vmatpush1.msra.mxu1 %v3213_v12 }
 0x645   :  { %1454 = vmatprep.subr.mxu0 %v3214_v13  ;;  %1525 = vmatprep.subr.mxu1 %v3215_v14 }
 0x646   :  { %1455 = vmatpush1.msra.mxu0 %v3216_v16  ;;  %1488 = vmatprep.mubr.f32.mxu0 %v3217_v18 }
 0x647   :  { %1526 = vmatpush1.msra.mxu1 %v3218_v20  ;;  %1559 = vmatprep.mubr.f32.mxu1 %v3217_v18 }
 0x6e7   :  { %v1302_v22 = vpop.f32.mrf.mxu0  ;;  %v1373_v36 = vpop.f32.mrf.mxu1 }
 0x6e8   :  { %v1382_v27 = vrot.slane %v1302_v22, 2  ;;  %v1384_v38 = vrot.slane %v1373_v36, 2 }
 0x6e9   :  { %v1304_v28 = vpop.f32.mrf.mxu0  ;;  %v1375_v39 = vpop.f32.mrf.mxu1 }
 0x6ea   :  { %v1390_v30 = vadd.f32 %v3219_v29, %v1382_v27  ;;  %v1383_v31 = vrot.slane %v1304_v28, 2  ;;  %v1392_v42 = vadd.f32 %v3221_v40, %v1384_v38  ;;  %v1385_v44 = vrot.slane %v1375_v39, 2 }
 0x6ec   :  { %v1689_v32 = vmul.f32 -1.442695, %v1390_v30  ;;  %v1391_v35 = vadd.f32 %v3220_v33, %v1383_v31  ;;  %v1691_v46 = vmul.f32 -1.442695, %v1392_v42  ;;  %v1393_v54 = vadd.f32 %v2855_v57, %v1385_v44 }
 0x6ee   :  { %1799 = vpow2.f32 %v1689_v32  ;;  %v1690_v37 = vmul.f32 -1.442695, %v1391_v35 }
 0x6f0   :  { %1801 = vpow2.f32 %v1690_v37 }
 0x6f1   :  { %1803 = vpow2.f32 %v1691_v46 }
 0x6fb   :  { %v1800_v48 = vpop.eup %1799 }
 0x6fc   :  { %v1403_v52 = vadd.f32 1.0, %v1800_v48 }
 0x6fd   :  { %v1802_v53 = vpop.eup %1801 }
 0x6fe   :  { %1805 = vrcp.f32 %v1403_v52  ;;  %v1404_v62 = vadd.f32 1.0, %v1802_v53  ;;  %v1804_v59 = vpop.eup %1803 }
 0x6ff   :  { %1807 = vtanh.f32 %v1393_v54  ;;  %v1405_v58 = vadd.f32 1.0, %v1804_v59 }
 0x700   :  { %1809 = vrcp.f32 %v1404_v62 }
 0x701   :  { %1811 = vrcp.f32 %v1405_v58 }
 0x70b   :  { %v1806_v23 = vpop.eup %1805 }
 0x70c   :  { %v1808_v1 = vpop.eup %1807 }
 0x70d   :  { %v1810_v61 = vpop.eup %1809  ;;  %v1417_v49 = vmul.f32 %v1808_v1, %v1806_v23 }
 0x70e   :  { %v1416_v17 = vmul.f32 %v1810_v61, %v1414_v51  ;;  %v1812_v43 = vpop.eup %1811 }
 0x710   :  { %v1418_v25 = vadd.f32 %v1417_v49, %v1416_v17 }
 0x712   :  { %1813 = vtanh.f32 %v1418_v25  ;;  %v1602_v13 = vrot.slane %v1418_v25, 7 }
 0x71f   :  { %v1814_v63 = vpop.eup %1813 }
 0x720   :  { %v1420_v41 = vmul.f32 %v1814_v63, %v1812_v43 }
 0x722   :  { %v1422_v26 = vrot.slane %v1420_v41, 6  ;;  %v1620_v34 = vsel %vm1619_vm5, %v2863_v55, %v1420_v41 }
 0x724   :  { %1489 = vmatmul.mubr.f32.vlgmr.msra.gmra.mxu0 %v1422_v26  ;;  %1560 = vmatmul.mubr.f32.vlgmr.msra.gmra.mxu1 %v1422_v26 }
 0x7e4   :  { %v1490_v60 = vpop.f32.mrf.mxu0  ;;  %v1561_v45 = vpop.f32.mrf.mxu1 }
 0x7e5   :  { %v1570_v15 = vrot.slane %v1490_v60, 1  ;;  %v1572_v9 = vrot.slane %v1561_v45, 1 }
 0x7e6   :  { %v1492_v50 = vpop.f32.mrf.mxu0  ;;  %v1563_v2 = vpop.f32.mrf.mxu1 }
 0x7e7   :  { %v1578_v47 = vadd.f32 %v3219_v29, %v1570_v15  ;;  %v1571_v19 = vrot.slane %v1492_v50, 1  ;;  %v1580_v3 = vadd.f32 %v3221_v40, %v1572_v9  ;;  %v1573_v55 = vrot.slane %v1563_v2, 1 }
 0x7e9   :  { %v1692_v21 = vmul.f32 -1.442695, %v1578_v47  ;;  %v1579_v24 = vadd.f32 %v3220_v33, %v1571_v19  ;;  %v1694_v0 = vmul.f32 -1.442695, %v1580_v3  ;;  %v1581_v5 = vadd.f32 %v2855_v57, %v1573_v55 }
 0x7eb   :  { %1815 = vpow2.f32 %v1692_v21  ;;  %v1693_v56 = vmul.f32 -1.442695, %v1579_v24 }
 0x7ed   :  { %1817 = vpow2.f32 %v1693_v56 }
 0x7ee   :  { %1819 = vpow2.f32 %v1694_v0 }
 0x7f8   :  { %v1816_v4 = vpop.eup %1815 }
 0x7f9   :  { %v1591_v6 = vadd.f32 1.0, %v1816_v4 }
 0x7fa   :  { %v1818_v7 = vpop.eup %1817 }
 0x7fb   :  { %1821 = vrcp.f32 %v1591_v6  ;;  %v1592_v8 = vadd.f32 1.0, %v1818_v7  ;;  %v1820_v10 = vpop.eup %1819 }
 0x7fc   :  { %1823 = vtanh.f32 %v1581_v5  ;;  %v1593_v16 = vadd.f32 1.0, %v1820_v10 }
 0x7fd   :  { %1825 = vrcp.f32 %v1592_v8 }
 0x7fe   :  { %1827 = vrcp.f32 %v1593_v16 }
 0x808   :  { %v1822_v11 = vpop.eup %1821 }
 0x809   :  { %v1824_v12 = vpop.eup %1823 }
 0x80a   :  { %v1826_v14 = vpop.eup %1825  ;;  %v1605_v20 = vmul.f32 %v1824_v12, %v1822_v11 }
 0x80b   :  { %v1604_v18 = vmul.f32 %v1826_v14, %v1602_v13  ;;  %v1828_v57 = vpop.eup %1827 }
 0x80d   :  { %v1606_v22 = vadd.f32 %v1605_v20, %v1604_v18 }
 0x80f   :  { %1625 = vst [vmem:[#allocation3 - $0x7] sm:$0x80] %v1606_v22  ;;  %1627 = vst [vmem:[#allocation12 - $0x7] sm:$0x80] %v1606_v22  ;;  %1829 = vtanh.f32 %v1606_v22 }
 0x81c   :  { %v1830_v27 = vpop.eup %1829 }
 0x81d   :  { %v1608_v28 = vmul.f32 %v1830_v27, %v1828_v57 }
 0x81f   :  { %1624 = vst [vmem:[#allocation2 - $0x7] sm:$0x80] %v1608_v28  ;;  %1626 = vst [vmem:[#allocation10 - $0x7] sm:$0x80] %v1608_v28  ;;  %v1622_v29 = vsel %vm1621_vm6, %v1620_v34, %v1608_v28 }
 0x820   :  { %1950 = shalt.err (!%p1947_p0)
}
 0x821   :  { %1647 = dma.vmem_to_hbm [thread:$0]  %s1645_s10, 16, %s2953_s5, [#allocation11]   ;;  %1623 = vst [vmem:[#allocation9] sm:$0xff] %v1622_v29 }
 0x822   :  { %s1959_s19 = scalar_lea.vmem %s1635_s12, 128  ;;  %p1964_p2 = scmp.lt.s32.totalorder %s1635_s12, %s1635_s12 }
 0x823   :  { %p1960_p1 = scmp.ne.s32.totalorder %s1635_s12, %s1959_s19  ;;  %p1965_p3 = scmp.lt.s32.totalorder %s1959_s19, %s1959_s19 }
 0x825   :  { %p1966_p4 = por %p1965_p3, %p1964_p2 }
 0x827   :  { %p1967_p5 = pnand %p1966_p4, %p1960_p1 }
 0x829   :  { %1970 = shalt.err (!%p1967_p5)
}
 0x82a   :  { %1637 = dma.vmem_to_hbm [thread:$0]  %s1635_s12, 128, %s2952_s4, [#allocation6]  }
 0x82b   :  { %s1979_s22 = scalar_lea.vmem %s1655_s14, 16  ;;  %s1983_s23 = scalar_lea.vmem %s1655_s14, 32 }
 0x82c   :  { %p1980_p6 = scmp.ne.s32.totalorder %s1655_s14, %s1979_s22  ;;  %p1984_p7 = scmp.lt.s32.totalorder %s1655_s14, %s1655_s14 }
 0x82d   :  { %p1985_p8 = scmp.lt.s32.totalorder %s1983_s23, %s1979_s22 }
 0x82f   :  { %p1986_p9 = por %p1985_p8, %p1984_p7 }
 0x831   :  { %p1987_p10 = pnand %p1986_p9, %p1980_p6 }
 0x833   :  { %1990 = shalt.err (!%p1987_p10)
}
 0x834   :  { %1657 = dma.vmem_to_hbm [thread:$0]  %s1655_s14, 16, %s2954_s6, [#allocation11]  }
 0x835   :  { %2003 = dma.done.wait [#allocation6], 128  }
 0x836   :  { %2004 = vsyncadd [#allocation6], 4294967168 }
 0x837   :  { %2005 = dma.done.wait [#allocation11], 32  }
 0x838   :  { %2006 = vsyncadd [#allocation11], 4294967264 }
 0x839   :  { %1667 = vsyncpa [#allocation5], 1 }
 0x83a   :  { %1668 = vsyncpa [#allocation8], 1 }
 0x83b   :  { %1669 = vsyncpa [#allocation6], 1 }
 0x83c   :  { %1670 = vsyncpa [#allocation11], 1 }

</bundles_post_ra>
